<compile_context>
chip_gen: v7x
topology: tpu7x:2x2x1
jax: 0.10.0
libtpu: 0.0.40
codegen_flags: <defaults>
</compile_context>

<pallas_src>
import functools

import jax
import jax.numpy as jnp
from jax.experimental import pallas as pl
from jax.experimental.pallas import tpu as pltpu

POOL = 4          # Maxout2d pool_size
EPS = 1e-5        # InstanceNorm2d default eps


def _round_up(x, m):
    return (x + m - 1) // m * m


def _resnet_block_kernel(x_ref, w_ref, b_ref, mask_ref, gamma_ref, beta_ref,
                         scse_ref, wsse_ref, bsse_ref, out_ref, xcol_ref,
                         *, fsize, dilv, H, W, pad, nb, conv_dtype,
                         conv_precision):
    HW = H * W
    C = gamma_ref.shape[0]
    c0 = (fsize - 1) // 2
    center = pad * (W + 1)

    # --- build the (T*C, nb*HW) im2col slab in VMEM scratch ------------------
    # Row block t*C:(t+1)*C is the tap-t shifted view of the flat activation;
    # horizontal edge taps are masked so row wraps contribute zero.
    for kh in range(fsize):
        for kw in range(fsize):
            t = kh * fsize + kw
            off = pad + ((kh - c0) * dilv + pad) * W + (kw - c0) * dilv
            for n in range(nb):
                xs = x_ref[n, :, off:off + HW]                      # (C, HW)
                if kw != c0:
                    xs = xs * mask_ref[kw:kw + 1, :]
                xcol_ref[t * C:(t + 1) * C, n * HW:(n + 1) * HW] = (
                    xs.astype(conv_dtype))

    # --- Maxout2d.lin : ONE stacked-K MXU matmul, f32 accumulation -----------
    y = jnp.dot(w_ref[...], xcol_ref[...],
                preferred_element_type=jnp.float32,
                precision=conv_precision) + b_ref[...]              # (4C, nb*HW)

    # --- maxout over pool_size=4 : sublane-aligned row blocks ----------------
    m = y[0:C, :]
    for p in range(1, POOL):
        m = jnp.maximum(m, y[p * C:(p + 1) * C, :])                 # (C, nb*HW)

    # --- per sample: InstanceNorm2d(affine) + SCSE + residual ----------------
    for n in range(nb):
        mn = m[:, n * HW:(n + 1) * HW]                              # (C, HW)
        mu = jnp.mean(mn, axis=1, keepdims=True)                    # (C, 1)
        var = jnp.mean((mn - mu) ** 2, axis=1, keepdims=True)       # (C, 1)
        z = (mn - mu) * jax.lax.rsqrt(var + EPS)
        z = z * gamma_ref[...] + beta_ref[...]                      # (C, HW)

        # sSE spatial gate (VPU/XLU): 1x1 conv over channels -> sigmoid.
        g = jax.nn.sigmoid(
            jnp.sum(z * wsse_ref[...], axis=0, keepdims=True)
            + bsse_ref[...])                                        # (1, HW)

        # cSE channel gate is the precomputed constant scse_ref (C,1); the
        # residual is the center tap of the padded activation stream (f32).
        res = x_ref[n, :, center:center + HW]                       # (C, HW)
        out_ref[n] = z * (scse_ref[...] + g) + res


def resnet_block_pallas(x_nchw, params, *, fsize, dilv,
                        conv_dtype=jnp.bfloat16, samples_per_step=1):
    """Forward pass of ResNet_Block (eval mode).  x_nchw: (N, C, H, W) f32.

    conv_dtype=jnp.bfloat16 : single-pass bf16 MXU contraction, f32 accumulate.
    conv_dtype=jnp.float32  : HIGHEST-precision contraction (tight checks).
    samples_per_step (nb)   : batch folding; nb samples per grid step with
        pixels concatenated on the lane axis.  Use nb>1 on v5e/v6e to amortize
        per-step overhead; keep >=2 grid steps on v7x (2 TensorCores).
    """
    assert fsize % 2 == 1, "odd kernel sizes only (as used by dmpfold)"
    w_conv, b_conv, gamma, beta, w1, w2, w_sse, b_sse = params
    N, C, H, W = x_nchw.shape
    nb = samples_per_step
    assert N % nb == 0
    HW = H * W
    T = fsize * fsize
    pad = dilv * (fsize - 1) // 2
    c0 = (fsize - 1) // 2
    Hp = H + 2 * pad

    # ---- single merged pad: [row/col head pad | H*W pixels | tail + align] --
    left = pad * (W + 1)
    L = _round_up(2 * pad + Hp * W, 128)
    x_flat = jnp.pad(x_nchw.reshape(N, C, HW),
                     ((0, 0), (0, 0), (left, L - left - HW)))       # (N, C, L)

    # ---- stacked conv weights: (4C, T*C); row = p*C + c, col = t*C + cin ----
    wt = w_conv.reshape(C, POOL, C, fsize, fsize)        # [c, p, cin, kh, kw]
    w_stack = jnp.transpose(wt, (1, 0, 3, 4, 2)).reshape(POOL * C, T * C)
    w_stack = w_stack.astype(conv_dtype)
    bt = b_conv.reshape(C, POOL).T.reshape(POOL * C, 1)             # row p*C+c

    # ---- horizontal validity masks per kw tap: (fsize, HW) ------------------
    jpos = jnp.arange(HW, dtype=jnp.int32) % W
    masks = jnp.stack(
        [((jpos + (kw - c0) * dilv >= 0) & (jpos + (kw - c0) * dilv < W))
         .astype(jnp.float32) for kw in range(fsize)], axis=0)

    gamma_c = gamma.reshape(C, 1)
    beta_c = beta.reshape(C, 1)
    # Hoisted cSE gate: spatial mean of the instance-normalized activation is
    # beta (up to ~1e-7 fp noise), so the channel gate is input-independent.
    s_const = jax.nn.sigmoid(w2 @ jnp.maximum(w1 @ beta, 0.0)).reshape(C, 1)
    wsse = w_sse.reshape(C, 1)
    bsse = b_sse.reshape(1, 1)

    conv_precision = (None
                      if jnp.dtype(conv_dtype) == jnp.dtype(jnp.bfloat16)
                      else jax.lax.Precision.HIGHEST)

    kernel = functools.partial(
        _resnet_block_kernel, fsize=fsize, dilv=dilv, H=H, W=W, pad=pad,
        nb=nb, conv_dtype=conv_dtype, conv_precision=conv_precision)

    out = pl.pallas_call(
        kernel,
        out_shape=jax.ShapeDtypeStruct((N, C, HW), jnp.float32),
        grid_spec=pltpu.PrefetchScalarGridSpec(
            num_scalar_prefetch=0,
            grid=(N // nb,),
            in_specs=[
                pl.BlockSpec((nb, C, L), lambda i: (i, 0, 0)),
                pl.BlockSpec((POOL * C, T * C), lambda i: (0, 0)),
                pl.BlockSpec((POOL * C, 1), lambda i: (0, 0)),
                pl.BlockSpec((fsize, HW), lambda i: (0, 0)),
                pl.BlockSpec((C, 1), lambda i: (0, 0)),
                pl.BlockSpec((C, 1), lambda i: (0, 0)),
                pl.BlockSpec((C, 1), lambda i: (0, 0)),
                pl.BlockSpec((C, 1), lambda i: (0, 0)),
                pl.BlockSpec((1, 1), lambda i: (0, 0)),
            ],
            out_specs=pl.BlockSpec((nb, C, HW), lambda i: (i, 0, 0)),
            scratch_shapes=[pltpu.VMEM((T * C, nb * HW), conv_dtype)],
        ),
        compiler_params=pltpu.CompilerParams(
            dimension_semantics=("parallel",),
            vmem_limit_bytes=32 * 1024 * 1024),
    )(x_flat, w_stack, bt, masks, gamma_c, beta_c, s_const, wsse, bsse)

    return out.reshape(N, C, H, W)


def resnet_block_reference(x, params, *, fsize, dilv):
    """Pure-JAX reference (mirrors the PyTorch forward, eval mode)."""
    w_conv, b_conv, gamma, beta, w1, w2, w_sse, b_sse = params
    N, C, H, W = x.shape
    pad = dilv * (fsize - 1) // 2
    y = jax.lax.conv_general_dilated(
        x, w_conv, (1, 1), [(pad, pad), (pad, pad)],
        rhs_dilation=(dilv, dilv),
        dimension_numbers=('NCHW', 'OIHW', 'NCHW'),
        precision=jax.lax.Precision.HIGHEST)
    y = y + b_conv[None, :, None, None]
    y = y.reshape(N, C, POOL, H, W).max(axis=2)
    mean = y.mean(axis=(2, 3), keepdims=True)
    var = ((y - mean) ** 2).mean(axis=(2, 3), keepdims=True)
    z = (y - mean) / jnp.sqrt(var + EPS)
    z = z * gamma[None, :, None, None] + beta[None, :, None, None]
    pooled = z.mean(axis=(2, 3))                                        # (N, C)
    s = jax.nn.sigmoid(jnp.maximum(pooled @ w1.T, 0.0) @ w2.T)          # (N, C)
    cse = z * s[:, :, None, None]
    g = jax.nn.sigmoid(
        jnp.einsum('nchw,c->nhw', z, w_sse.reshape(C)) + b_sse[0])[:, None]
    sse = z * g
    return cse + sse + x


def make_params(key, width, fsize, reduction=16):
    ks = jax.random.split(key, 8)
    Cr = width // reduction
    w_conv = jax.random.normal(ks[0], (width * POOL, width, fsize, fsize),
                               jnp.float32) * 0.05
    b_conv = jax.random.normal(ks[1], (width * POOL,), jnp.float32) * 0.05
    gamma = 1.0 + 0.1 * jax.random.normal(ks[2], (width,), jnp.float32)
    beta = 0.1 * jax.random.normal(ks[3], (width,), jnp.float32)
    w1 = jax.random.normal(ks[4], (Cr, width), jnp.float32) * 0.1       # Linear(width->Cr)
    w2 = jax.random.normal(ks[5], (width, Cr), jnp.float32) * 0.1       # Linear(Cr->width)
    w_sse = jax.random.normal(ks[6], (1, width, 1, 1), jnp.float32) * 0.1
    b_sse = jax.random.normal(ks[7], (1,), jnp.float32) * 0.1
    return (w_conv, b_conv, gamma, beta, w1, w2, w_sse, b_sse)


if __name__ == "__main__":
    width, fsize, dilv, nblock = 32, 3, 1, 4
    N, H, W = 2, 16, 16

    key = jax.random.PRNGKey(0)
    kx, kp = jax.random.split(key)
    x = jax.random.normal(kx, (N, width, H, W), jnp.float32)
    params = make_params(kp, width, fsize)

    ref = resnet_block_reference(x, params, fsize=fsize, dilv=dilv)

    # Fast path, one sample per step (>=2 parallel grid steps for v7x).
    fwd_fast = jax.jit(functools.partial(
        resnet_block_pallas, fsize=fsize, dilv=dilv,
        conv_dtype=jnp.bfloat16, samples_per_step=1))
    out_fast = jax.block_until_ready(fwd_fast(x, params))
    assert out_fast.shape == x.shape and out_fast.dtype == x.dtype
    err_fast = float(jnp.max(jnp.abs(out_fast - ref)))
    assert jnp.allclose(out_fast, ref, atol=5e-2, rtol=3e-2), err_fast

    # Fast path, batch-folded (one grid step, wider lane axis) for v5e/v6e.
    fwd_fold = jax.jit(functools.partial(
        resnet_block_pallas, fsize=fsize, dilv=dilv,
        conv_dtype=jnp.bfloat16, samples_per_step=N))
    out_fold = jax.block_until_ready(fwd_fold(x, params))
    err_fold = float(jnp.max(jnp.abs(out_fold - ref)))
    assert jnp.allclose(out_fold, ref, atol=5e-2, rtol=3e-2), err_fold

    # High-precision path (f32 HIGHEST contraction) for a tight semantic check
    # of the stacked-matmul / folded indexing (cSE hoist deviates only by fp
    # noise, far below this tolerance).
    fwd_hi = jax.jit(functools.partial(
        resnet_block_pallas, fsize=fsize, dilv=dilv,
        conv_dtype=jnp.float32, samples_per_step=N))
    out_hi = jax.block_until_ready(fwd_hi(x, params))
    err_hi = float(jnp.max(jnp.abs(out_hi - ref)))
    assert jnp.allclose(out_hi, ref, atol=5e-4, rtol=5e-4), err_hi

    print("KERNEL_OK")
</pallas_src>

<mosaic_0001>
module attributes {stable_mosaic.version = 11 : i64} {
  func.func @_resnet_block_kernel(%arg0: i32, %arg1: memref<1x32x384xf32, #tpu.memory_space<vmem>>, %arg2: memref<128x288xbf16, #tpu.memory_space<vmem>>, %arg3: memref<128x1xf32, #tpu.memory_space<vmem>>, %arg4: memref<3x256xf32, #tpu.memory_space<vmem>>, %arg5: memref<32x1xf32, #tpu.memory_space<vmem>>, %arg6: memref<32x1xf32, #tpu.memory_space<vmem>>, %arg7: memref<32x1xf32, #tpu.memory_space<vmem>>, %arg8: memref<32x1xf32, #tpu.memory_space<vmem>>, %arg9: memref<1x1xf32, #tpu.memory_space<vmem>>, %arg10: memref<1x32x256xf32, #tpu.memory_space<vmem>>, %arg11: memref<288x256xbf16, #tpu.memory_space<vmem>>) attributes {dimension_semantics = [#tpu.dimension_semantics<parallel>], iteration_bounds = array<i64: 2>, scalar_prefetch = 0 : i64, scratch_operands = 1 : i64, tpu.core_type = #tpu.core_type<tc>, window_params = [{transform_indices = @transform_0, window_bounds = array<i64: 1, 32, 384>}, {pipeline_mode = #tpu.pipeline_mode<synchronous>, transform_indices = @transform_1, window_bounds = array<i64: 128, 288>}, {pipeline_mode = #tpu.pipeline_mode<synchronous>, transform_indices = @transform_2, window_bounds = array<i64: 128, 1>}, {pipeline_mode = #tpu.pipeline_mode<synchronous>, transform_indices = @transform_3, window_bounds = array<i64: 3, 256>}, {pipeline_mode = #tpu.pipeline_mode<synchronous>, transform_indices = @transform_4, window_bounds = array<i64: 32, 1>}, {pipeline_mode = #tpu.pipeline_mode<synchronous>, transform_indices = @transform_5, window_bounds = array<i64: 32, 1>}, {pipeline_mode = #tpu.pipeline_mode<synchronous>, transform_indices = @transform_6, window_bounds = array<i64: 32, 1>}, {pipeline_mode = #tpu.pipeline_mode<synchronous>, transform_indices = @transform_7, window_bounds = array<i64: 32, 1>}, {pipeline_mode = #tpu.pipeline_mode<synchronous>, transform_indices = @transform_8, window_bounds = array<i64: 1, 1>}, {transform_indices = @transform_9, window_bounds = array<i64: 1, 32, 256>}]} {
    %c0 = arith.constant 0 : index
    %c0_0 = arith.constant 0 : index
    %c0_1 = arith.constant 0 : index
    %0 = vector.load %arg1[%c0, %c0_0, %c0_1] : memref<1x32x384xf32, #tpu.memory_space<vmem>>, vector<1x32x256xf32>
    %1 = vector.shape_cast %0 : vector<1x32x256xf32> to vector<32x256xf32>
    %c0_2 = arith.constant 0 : index
    %c0_3 = arith.constant 0 : index
    %2 = vector.load %arg4[%c0_2, %c0_3] : memref<3x256xf32, #tpu.memory_space<vmem>>, vector<1x256xf32>
    %3 = vector.broadcast %2 : vector<1x256xf32> to vector<32x256xf32>
    %4 = arith.mulf %1, %3 : vector<32x256xf32>
    %5 = arith.truncf %4 : vector<32x256xf32> to vector<32x256xbf16>
    %c0_4 = arith.constant 0 : index
    %c0_5 = arith.constant 0 : index
    %6 = vector.load %arg11[%c0_4, %c0_5] : memref<288x256xbf16, #tpu.memory_space<vmem>>, vector<32x256xbf16>
    tpu.vector_store %arg11[%c0_4, %c0_5], %5 {strides = array<i32>} : memref<288x256xbf16, #tpu.memory_space<vmem>>, vector<32x256xbf16>,
    %c0_6 = arith.constant 0 : index
    %c0_7 = arith.constant 0 : index
    %c1 = arith.constant 1 : index
    %7 = vector.load %arg1[%c0_6, %c0_7, %c1] : memref<1x32x384xf32, #tpu.memory_space<vmem>>, vector<1x32x256xf32>
    %8 = vector.shape_cast %7 : vector<1x32x256xf32> to vector<32x256xf32>
    %9 = arith.truncf %8 : vector<32x256xf32> to vector<32x256xbf16>
    %c32 = arith.constant 32 : index
    %c0_8 = arith.constant 0 : index
    %10 = vector.load %arg11[%c32, %c0_8] : memref<288x256xbf16, #tpu.memory_space<vmem>>, vector<32x256xbf16>
    tpu.vector_store %arg11[%c32, %c0_8], %9 {strides = array<i32>} : memref<288x256xbf16, #tpu.memory_space<vmem>>, vector<32x256xbf16>,
    %c0_9 = arith.constant 0 : index
    %c0_10 = arith.constant 0 : index
    %c2 = arith.constant 2 : index
    %11 = vector.load %arg1[%c0_9, %c0_10, %c2] : memref<1x32x384xf32, #tpu.memory_space<vmem>>, vector<1x32x256xf32>
    %12 = vector.shape_cast %11 : vector<1x32x256xf32> to vector<32x256xf32>
    %c2_11 = arith.constant 2 : index
    %c0_12 = arith.constant 0 : index
    %13 = vector.load %arg4[%c2_11, %c0_12] : memref<3x256xf32, #tpu.memory_space<vmem>>, vector<1x256xf32>
    %14 = vector.broadcast %13 : vector<1x256xf32> to vector<32x256xf32>
    %15 = arith.mulf %12, %14 : vector<32x256xf32>
    %16 = arith.truncf %15 : vector<32x256xf32> to vector<32x256xbf16>
    %c64 = arith.constant 64 : index
    %c0_13 = arith.constant 0 : index
    %17 = vector.load %arg11[%c64, %c0_13] : memref<288x256xbf16, #tpu.memory_space<vmem>>, vector<32x256xbf16>
    tpu.vector_store %arg11[%c64, %c0_13], %16 {strides = array<i32>} : memref<288x256xbf16, #tpu.memory_space<vmem>>, vector<32x256xbf16>,
    %c0_14 = arith.constant 0 : index
    %c0_15 = arith.constant 0 : index
    %c16 = arith.constant 16 : index
    %18 = vector.load %arg1[%c0_14, %c0_15, %c16] : memref<1x32x384xf32, #tpu.memory_space<vmem>>, vector<1x32x256xf32>
    %19 = vector.shape_cast %18 : vector<1x32x256xf32> to vector<32x256xf32>
    %c0_16 = arith.constant 0 : index
    %c0_17 = arith.constant 0 : index
    %20 = vector.load %arg4[%c0_16, %c0_17] : memref<3x256xf32, #tpu.memory_space<vmem>>, vector<1x256xf32>
    %21 = vector.broadcast %20 : vector<1x256xf32> to vector<32x256xf32>
    %22 = arith.mulf %19, %21 : vector<32x256xf32>
    %23 = arith.truncf %22 : vector<32x256xf32> to vector<32x256xbf16>
    %c96 = arith.constant 96 : index
    %c0_18 = arith.constant 0 : index
    %24 = vector.load %arg11[%c96, %c0_18] : memref<288x256xbf16, #tpu.memory_space<vmem>>, vector<32x256xbf16>
    tpu.vector_store %arg11[%c96, %c0_18], %23 {strides = array<i32>} : memref<288x256xbf16, #tpu.memory_space<vmem>>, vector<32x256xbf16>,
    %c0_19 = arith.constant 0 : index
    %c0_20 = arith.constant 0 : index
    %c17 = arith.constant 17 : index
    %25 = vector.load %arg1[%c0_19, %c0_20, %c17] : memref<1x32x384xf32, #tpu.memory_space<vmem>>, vector<1x32x256xf32>
    %26 = vector.shape_cast %25 : vector<1x32x256xf32> to vector<32x256xf32>
    %27 = arith.truncf %26 : vector<32x256xf32> to vector<32x256xbf16>
    %c128 = arith.constant 128 : index
    %c0_21 = arith.constant 0 : index
    %28 = vector.load %arg11[%c128, %c0_21] : memref<288x256xbf16, #tpu.memory_space<vmem>>, vector<32x256xbf16>
    tpu.vector_store %arg11[%c128, %c0_21], %27 {strides = array<i32>} : memref<288x256xbf16, #tpu.memory_space<vmem>>, vector<32x256xbf16>,
    %c0_22 = arith.constant 0 : index
    %c0_23 = arith.constant 0 : index
    %c18 = arith.constant 18 : index
    %29 = vector.load %arg1[%c0_22, %c0_23, %c18] : memref<1x32x384xf32, #tpu.memory_space<vmem>>, vector<1x32x256xf32>
    %30 = vector.shape_cast %29 : vector<1x32x256xf32> to vector<32x256xf32>
    %c2_24 = arith.constant 2 : index
    %c0_25 = arith.constant 0 : index
    %31 = vector.load %arg4[%c2_24, %c0_25] : memref<3x256xf32, #tpu.memory_space<vmem>>, vector<1x256xf32>
    %32 = vector.broadcast %31 : vector<1x256xf32> to vector<32x256xf32>
    %33 = arith.mulf %30, %32 : vector<32x256xf32>
    %34 = arith.truncf %33 : vector<32x256xf32> to vector<32x256xbf16>
    %c160 = arith.constant 160 : index
    %c0_26 = arith.constant 0 : index
    %35 = vector.load %arg11[%c160, %c0_26] : memref<288x256xbf16, #tpu.memory_space<vmem>>, vector<32x256xbf16>
    tpu.vector_store %arg11[%c160, %c0_26], %34 {strides = array<i32>} : memref<288x256xbf16, #tpu.memory_space<vmem>>, vector<32x256xbf16>,
    %c0_27 = arith.constant 0 : index
    %c0_28 = arith.constant 0 : index
    %c32_29 = arith.constant 32 : index
    %36 = vector.load %arg1[%c0_27, %c0_28, %c32_29] : memref<1x32x384xf32, #tpu.memory_space<vmem>>, vector<1x32x256xf32>
    %37 = vector.shape_cast %36 : vector<1x32x256xf32> to vector<32x256xf32>
    %c0_30 = arith.constant 0 : index
    %c0_31 = arith.constant 0 : index
    %38 = vector.load %arg4[%c0_30, %c0_31] : memref<3x256xf32, #tpu.memory_space<vmem>>, vector<1x256xf32>
    %39 = vector.broadcast %38 : vector<1x256xf32> to vector<32x256xf32>
    %40 = arith.mulf %37, %39 : vector<32x256xf32>
    %41 = arith.truncf %40 : vector<32x256xf32> to vector<32x256xbf16>
    %c192 = arith.constant 192 : index
    %c0_32 = arith.constant 0 : index
    %42 = vector.load %arg11[%c192, %c0_32] : memref<288x256xbf16, #tpu.memory_space<vmem>>, vector<32x256xbf16>
    tpu.vector_store %arg11[%c192, %c0_32], %41 {strides = array<i32>} : memref<288x256xbf16, #tpu.memory_space<vmem>>, vector<32x256xbf16>,
    %c0_33 = arith.constant 0 : index
    %c0_34 = arith.constant 0 : index
    %c33 = arith.constant 33 : index
    %43 = vector.load %arg1[%c0_33, %c0_34, %c33] : memref<1x32x384xf32, #tpu.memory_space<vmem>>, vector<1x32x256xf32>
    %44 = vector.shape_cast %43 : vector<1x32x256xf32> to vector<32x256xf32>
    %45 = arith.truncf %44 : vector<32x256xf32> to vector<32x256xbf16>
    %c224 = arith.constant 224 : index
    %c0_35 = arith.constant 0 : index
    %46 = vector.load %arg11[%c224, %c0_35] : memref<288x256xbf16, #tpu.memory_space<vmem>>, vector<32x256xbf16>
    tpu.vector_store %arg11[%c224, %c0_35], %45 {strides = array<i32>} : memref<288x256xbf16, #tpu.memory_space<vmem>>, vector<32x256xbf16>,
    %c0_36 = arith.constant 0 : index
    %c0_37 = arith.constant 0 : index
    %c34 = arith.constant 34 : index
    %47 = vector.load %arg1[%c0_36, %c0_37, %c34] : memref<1x32x384xf32, #tpu.memory_space<vmem>>, vector<1x32x256xf32>
    %48 = vector.shape_cast %47 : vector<1x32x256xf32> to vector<32x256xf32>
    %c2_38 = arith.constant 2 : index
    %c0_39 = arith.constant 0 : index
    %49 = vector.load %arg4[%c2_38, %c0_39] : memref<3x256xf32, #tpu.memory_space<vmem>>, vector<1x256xf32>
    %50 = vector.broadcast %49 : vector<1x256xf32> to vector<32x256xf32>
    %51 = arith.mulf %48, %50 : vector<32x256xf32>
    %52 = arith.truncf %51 : vector<32x256xf32> to vector<32x256xbf16>
    %c256 = arith.constant 256 : index
    %c0_40 = arith.constant 0 : index
    %53 = vector.load %arg11[%c256, %c0_40] : memref<288x256xbf16, #tpu.memory_space<vmem>>, vector<32x256xbf16>
    tpu.vector_store %arg11[%c256, %c0_40], %52 {strides = array<i32>} : memref<288x256xbf16, #tpu.memory_space<vmem>>, vector<32x256xbf16>,
    %c0_41 = arith.constant 0 : index
    %c0_42 = arith.constant 0 : index
    %54 = vector.load %arg2[%c0_41, %c0_42] : memref<128x288xbf16, #tpu.memory_space<vmem>>, vector<128x288xbf16>
    %c0_43 = arith.constant 0 : index
    %c0_44 = arith.constant 0 : index
    %55 = vector.load %arg11[%c0_43, %c0_44] : memref<288x256xbf16, #tpu.memory_space<vmem>>, vector<288x256xbf16>
    %cst = arith.constant dense<0.000000e+00> : vector<128x256xf32>
    %56 = tpu.matmul %54, %55, %cst {dimension_numbers = #tpu.dot_dimension_numbers<[1], [0], [0], [1], [0, 0, 1, 1], [], []>} : vector<128x288xbf16>, vector<288x256xbf16>, vector<128x256xf32> -> vector<128x256xf32>
    %c0_45 = arith.constant 0 : index
    %c0_46 = arith.constant 0 : index
    %57 = vector.load %arg3[%c0_45, %c0_46] : memref<128x1xf32, #tpu.memory_space<vmem>>, vector<128x1xf32>
    %58 = vector.broadcast %57 : vector<128x1xf32> to vector<128x256xf32>
    %59 = arith.addf %56, %58 : vector<128x256xf32>
    %60 = vector.extract_strided_slice %59 {offsets = [0, 0], sizes = [32, 256], strides = [1, 1]} : vector<128x256xf32> to vector<32x256xf32>
    %61 = vector.extract_strided_slice %59 {offsets = [32, 0], sizes = [32, 256], strides = [1, 1]} : vector<128x256xf32> to vector<32x256xf32>
    %62 = arith.maximumf %60, %61 : vector<32x256xf32>
    %63 = vector.extract_strided_slice %59 {offsets = [64, 0], sizes = [32, 256], strides = [1, 1]} : vector<128x256xf32> to vector<32x256xf32>
    %64 = arith.maximumf %62, %63 : vector<32x256xf32>
    %65 = vector.extract_strided_slice %59 {offsets = [96, 0], sizes = [32, 256], strides = [1, 1]} : vector<128x256xf32> to vector<32x256xf32>
    %66 = arith.maximumf %64, %65 : vector<32x256xf32>
    %cst_47 = arith.constant dense<0.000000e+00> : vector<32xf32>
    %67 = vector.multi_reduction <add>, %66, %cst_47 [1] : vector<32x256xf32> to vector<32xf32>
    %68 = vector.shape_cast %67 : vector<32xf32> to vector<32x1xf32>
    %cst_48 = arith.constant 2.560000e+02 : f32
    %69 = vector.broadcast %cst_48 : f32 to vector<32x1xf32>
    %70 = arith.divf %68, %69 : vector<32x1xf32>
    %71 = vector.broadcast %70 : vector<32x1xf32> to vector<32x256xf32>
    %72 = arith.subf %66, %71 : vector<32x256xf32>
    %73 = arith.mulf %72, %72 : vector<32x256xf32>
    %cst_49 = arith.constant dense<0.000000e+00> : vector<32xf32>
    %74 = vector.multi_reduction <add>, %73, %cst_49 [1] : vector<32x256xf32> to vector<32xf32>
    %75 = vector.shape_cast %74 : vector<32xf32> to vector<32x1xf32>
    %cst_50 = arith.constant 2.560000e+02 : f32
    %76 = vector.broadcast %cst_50 : f32 to vector<32x1xf32>
    %77 = arith.divf %75, %76 : vector<32x1xf32>
    %78 = vector.broadcast %70 : vector<32x1xf32> to vector<32x256xf32>
    %79 = arith.subf %66, %78 : vector<32x256xf32>
    %cst_51 = arith.constant 9.99999974E-6 : f32
    %80 = vector.broadcast %cst_51 : f32 to vector<32x1xf32>
    %81 = arith.addf %77, %80 : vector<32x1xf32>
    %82 = math.rsqrt %81 : vector<32x1xf32>
    %83 = vector.broadcast %82 : vector<32x1xf32> to vector<32x256xf32>
    %84 = arith.mulf %79, %83 : vector<32x256xf32>
    %c0_52 = arith.constant 0 : index
    %c0_53 = arith.constant 0 : index
    %85 = vector.load %arg5[%c0_52, %c0_53] : memref<32x1xf32, #tpu.memory_space<vmem>>, vector<32x1xf32>
    %86 = vector.broadcast %85 : vector<32x1xf32> to vector<32x256xf32>
    %87 = arith.mulf %84, %86 : vector<32x256xf32>
    %c0_54 = arith.constant 0 : index
    %c0_55 = arith.constant 0 : index
    %88 = vector.load %arg6[%c0_54, %c0_55] : memref<32x1xf32, #tpu.memory_space<vmem>>, vector<32x1xf32>
    %89 = vector.broadcast %88 : vector<32x1xf32> to vector<32x256xf32>
    %90 = arith.addf %87, %89 : vector<32x256xf32>
    %c0_56 = arith.constant 0 : index
    %c0_57 = arith.constant 0 : index
    %91 = vector.load %arg8[%c0_56, %c0_57] : memref<32x1xf32, #tpu.memory_space<vmem>>, vector<32x1xf32>
    %92 = vector.broadcast %91 : vector<32x1xf32> to vector<32x256xf32>
    %93 = arith.mulf %90, %92 : vector<32x256xf32>
    %cst_58 = arith.constant dense<0.000000e+00> : vector<256xf32>
    %94 = vector.multi_reduction <add>, %93, %cst_58 [0] : vector<32x256xf32> to vector<256xf32>
    %95 = vector.shape_cast %94 : vector<256xf32> to vector<1x256xf32>
    %c0_59 = arith.constant 0 : index
    %c0_60 = arith.constant 0 : index
    %96 = vector.load %arg9[%c0_59, %c0_60] : memref<1x1xf32, #tpu.memory_space<vmem>>, vector<1x1xf32>
    %97 = vector.broadcast %96 : vector<1x1xf32> to vector<1x256xf32>
    %98 = arith.addf %95, %97 : vector<1x256xf32>
    %99 = arith.negf %98 : vector<1x256xf32>
    %100 = math.exp %99 : vector<1x256xf32>
    %cst_61 = arith.constant 1.000000e+00 : f32
    %101 = vector.broadcast %cst_61 : f32 to vector<1x256xf32>
    %102 = arith.addf %101, %100 : vector<1x256xf32>
    %103 = arith.divf %101, %102 : vector<1x256xf32>
    %c0_62 = arith.constant 0 : index
    %c0_63 = arith.constant 0 : index
    %c17_64 = arith.constant 17 : index
    %104 = vector.load %arg1[%c0_62, %c0_63, %c17_64] : memref<1x32x384xf32, #tpu.memory_space<vmem>>, vector<1x32x256xf32>
    %105 = vector.shape_cast %104 : vector<1x32x256xf32> to vector<32x256xf32>
    %c0_65 = arith.constant 0 : index
    %c0_66 = arith.constant 0 : index
    %106 = vector.load %arg7[%c0_65, %c0_66] : memref<32x1xf32, #tpu.memory_space<vmem>>, vector<32x1xf32>
    %107 = vector.broadcast %106 : vector<32x1xf32> to vector<32x256xf32>
    %108 = vector.broadcast %103 : vector<1x256xf32> to vector<32x256xf32>
    %109 = arith.addf %107, %108 : vector<32x256xf32>
    %110 = arith.mulf %90, %109 : vector<32x256xf32>
    %111 = arith.addf %110, %105 : vector<32x256xf32>
    %c0_67 = arith.constant 0 : index
    %c0_68 = arith.constant 0 : index
    %c0_69 = arith.constant 0 : index
    %112 = vector.load %arg10[%c0_67, %c0_68, %c0_69] : memref<1x32x256xf32, #tpu.memory_space<vmem>>, vector<1x32x256xf32>
    %113 = vector.shape_cast %112 : vector<1x32x256xf32> to vector<32x256xf32>
    %114 = vector.shape_cast %111 : vector<32x256xf32> to vector<1x32x256xf32>
    tpu.vector_store %arg10[%c0_67, %c0_68, %c0_69], %114 {strides = array<i32>} : memref<1x32x256xf32, #tpu.memory_space<vmem>>, vector<1x32x256xf32>,
    return
  }
  func.func @transform_0(%arg0: i32) -> (i32, i32, i32) {
    %c0_i32 = arith.constant 0 : i32
    %c0_i32_0 = arith.constant 0 : i32
    %c0_i32_1 = arith.constant 0 : i32
    return %arg0, %c0_i32, %c0_i32_0 : i32, i32, i32
  }
  func.func @transform_1(%arg0: i32) -> (i32, i32) {
    %c0_i32 = arith.constant 0 : i32
    %c0_i32_0 = arith.constant 0 : i32
    %c0_i32_1 = arith.constant 0 : i32
    return %c0_i32, %c0_i32_0 : i32, i32
  }
  func.func @transform_2(%arg0: i32) -> (i32, i32) {
    %c0_i32 = arith.constant 0 : i32
    %c0_i32_0 = arith.constant 0 : i32
    %c0_i32_1 = arith.constant 0 : i32
    return %c0_i32, %c0_i32_0 : i32, i32
  }
  func.func @transform_3(%arg0: i32) -> (i32, i32) {
    %c0_i32 = arith.constant 0 : i32
    %c0_i32_0 = arith.constant 0 : i32
    %c0_i32_1 = arith.constant 0 : i32
    return %c0_i32, %c0_i32_0 : i32, i32
  }
  func.func @transform_4(%arg0: i32) -> (i32, i32) {
    %c0_i32 = arith.constant 0 : i32
    %c0_i32_0 = arith.constant 0 : i32
    %c0_i32_1 = arith.constant 0 : i32
    return %c0_i32, %c0_i32_0 : i32, i32
  }
  func.func @transform_5(%arg0: i32) -> (i32, i32) {
    %c0_i32 = arith.constant 0 : i32
    %c0_i32_0 = arith.constant 0 : i32
    %c0_i32_1 = arith.constant 0 : i32
    return %c0_i32, %c0_i32_0 : i32, i32
  }
  func.func @transform_6(%arg0: i32) -> (i32, i32) {
    %c0_i32 = arith.constant 0 : i32
    %c0_i32_0 = arith.constant 0 : i32
    %c0_i32_1 = arith.constant 0 : i32
    return %c0_i32, %c0_i32_0 : i32, i32
  }
  func.func @transform_7(%arg0: i32) -> (i32, i32) {
    %c0_i32 = arith.constant 0 : i32
    %c0_i32_0 = arith.constant 0 : i32
    %c0_i32_1 = arith.constant 0 : i32
    return %c0_i32, %c0_i32_0 : i32, i32
  }
  func.func @transform_8(%arg0: i32) -> (i32, i32) {
    %c0_i32 = arith.constant 0 : i32
    %c0_i32_0 = arith.constant 0 : i32
    %c0_i32_1 = arith.constant 0 : i32
    return %c0_i32, %c0_i32_0 : i32, i32
  }
  func.func @transform_9(%arg0: i32) -> (i32, i32, i32) {
    %c0_i32 = arith.constant 0 : i32
    %c0_i32_0 = arith.constant 0 : i32
    %c0_i32_1 = arith.constant 0 : i32
    return %arg0, %c0_i32, %c0_i32_0 : i32, i32, i32
  }
}

</mosaic_0001>

<bundles_post_ra>
// kernel: resnet_block_pallas.1
= control target key start
LH: loop header
LB: loop body
LE: loop exit
PB: predicated region body
PF: predicated region fallthrough
CT: control target
= control target key end

     0   :  { %s2117_s11 = smov 0   ;;  %s2778_s0 = inlined_call_operand.vmem [shape: f32[2,32,384], index: 0, kind: input, shape index: {}]   ;;  %s2779_s1 = inlined_call_operand.vmem [shape: bf16[128,288], index: 1, kind: input, shape index: {}]   ;;  %s2780_s2 = inlined_call_operand.vmem [shape: f32[128,1], index: 2, kind: input, shape index: {}]   ;;  %s2781_s3 = inlined_call_operand.vmem [shape: f32[3,256], index: 3, kind: input, shape index: {}]   ;;  %s2782_s4 = inlined_call_operand.vmem [shape: f32[32,1], index: 4, kind: input, shape index: {}]   ;;  %s2783_s5 = inlined_call_operand.vmem [shape: f32[32,1], index: 5, kind: input, shape index: {}]   ;;  %s2784_s6 = inlined_call_operand.vmem [shape: f32[32,1], index: 6, kind: input, shape index: {}]   ;;  %s2785_s7 = inlined_call_operand.vmem [shape: f32[32,1], index: 7, kind: input, shape index: {}]   ;;  %s2786_s8 = inlined_call_operand.<no memory space> [shape: f32[1,1], index: 8, kind: input, shape index: {}]   ;;  %s2787_s9 = inlined_call_operand.vmem [shape: f32[2,32,256], index: 9, kind: output, shape index: {}]  }
   0x1   :  { %v14_v0 = vstv %s2786_s8 }
   0x2   :  { %15 = vst [vmem:[#allocation3] sm:$0x1] %v14_v0 }
   0x3 LB: > { %s1857_s12 = sadd.s32 4294967295, %s2048_s11   ;;  %p1861_p0 = scmp.ge.s32.totalorder %s2048_s11, 1  ;;  %s2048_s11 = sphi %s2117_s11, %s21_s11  }
   0x4   : > { %p289_p1 = scmp.lt.s32.totalorder %s2048_s11, 3 }
   0x6   : > { %p290_p2 = pnand %p1861_p0, %p289_p1 }
   0x7   : > { %v346_v1 = vlaneseq (!%p290_p2)  ;;  %v1865_v3 = vld [vmem:[%s2781_s3 + $0x2] ss:$4 sm:$0x3] (!%p290_p2)  ;;  %v514_v4 = vld [vmem:[%s2781_s3] ss:$4 sm:$0x3] (!%p290_p2) }
   0x8   : > { %293 = sbr.rel (%p290_p2) target bundleno = 969 (0x3c9), region = 56  ;;  %p325_p3 = scmp.lt.s32.totalorder (!%p290_p2), %s1857_s12, 1  ;;  %v1866_v9 = vld [vmem:[%s2781_s3 + $0x2] ss:$4 sm:$0x3] (!%p290_p2)  ;;  %vm448_vm0 = vcmask (!%p290_p2), 15360  }
   0x9   : > { %v347_v2 = vshrl.u32 (!%p290_p2), %v346_v1, 7  ;;  %s2050_s18 = smov (!%p290_p2), 2   ;;  %s2051_s19 = smov (!%p290_p2), 16   ;;  %v723_v14 = vld [vmem:[%s2781_s3] ss:$4 sm:$0x3] (!%p290_p2) }
   0xa   : > { %v1867_v15 = vld [vmem:[%s2781_s3 + $0x2] ss:$4 sm:$0x3] (!%p290_p2)  ;;  %s2052_s25 = smov (!%p290_p2), 18   ;;  %s2053_s29 = smov (!%p290_p2), 32   ;;  %vm528_vm1 = vcmask (!%p290_p2), 130048  }
   0xb   : > { %v2131_v5 = vsub.s32 (!%p290_p2), 0, %v347_v2  ;;  %v2133_v6 = vsub.s32 (!%p290_p2), 1, %v347_v2  ;;  %s2054_s30 = smov (!%p290_p2), 34   ;;  %s2055_s10 = smov (!%p290_p2), 127   ;;  %vm408_vm2 = vcmask (!%p290_p2), 1039360   ;;  %vm657_vm3 = vcmask (!%p290_p2), 146432  }
   0xc   : > { %s2056_s13 = smov (!%p290_p2), 111   ;;  %v344_v38 = vld [vmem:[%s2781_s3] ss:$4 sm:$0x3] (!%p290_p2)  ;;  %s2057_s15 = smov (!%p290_p2), 126   ;;  %vm737_vm4 = vcmask (!%p290_p2), 261120  }
   0xd   : > { %v439_v7 = vrot.slane (!%p290_p2), %v1865_v3, %v2131_v5  ;;  %v519_v8 = vrot.slane (!%p290_p2), %v514_v4, %v2131_v5  ;;  %v443_v10 = vrot.slane (!%p290_p2), %v1865_v3, %v2133_v6  ;;  %v523_v11 = vrot.slane (!%p290_p2), %v514_v4, %v2133_v6  ;;  %s2058_s16 = smov (!%p290_p2), 112   ;;  %s2059_s17 = smov (!%p290_p2), 110  }
   0xe   : > { %v648_v12 = vrot.slane (!%p290_p2), %v1866_v9, %v2131_v5  ;;  %v652_v13 = vrot.slane (!%p290_p2), %v1866_v9, %v2133_v6  ;;  %v732_v16 = vrot.slane (!%p290_p2), %v723_v14, %v2133_v6  ;;  %v728_v17 = vrot.slane (!%p290_p2), %v723_v14, %v2131_v5  ;;  %s2062_s20 = smov (!%p290_p2), 94  }
   0xf   : > { %444 = vrot.lane.b32.xlu0 %v439_v7, %s2050_s18  ;;  %524 = vrot.lane.b32.xlu1 %v519_v8, %s2051_s19  ;;  %s2789_s12 = smov (!%p325_p3, %s1857_s12), 1  ;;  %v861_v18 = vrot.slane %v1867_v15, %v2133_v6  ;;  %v857_v19 = vrot.slane %v1867_v15, %v2131_v5  ;;  %v353_v39 = vrot.slane %v344_v38, %v2133_v6  ;;  %vm866_vm5 = vcmask 277504  }
  0x10   : > { %s1969_s22 = smul.u32 96, %s2789_s12  ;;  %v349_v40 = vrot.slane %v344_v38, %v2131_v5  ;;  %vm489_vm6 = vcmask 1031168   ;;  %vm569_vm7 = vcmask 916480   ;;  %vm618_vm8 = vcmask 908288  }
  0x11   : > { %vm698_vm9 = vcmask 900096   ;;  %vm778_vm10 = vcmask 785408   ;;  %vm827_vm11 = vcmask 777216   ;;  %vm907_vm12 = vcmask 769024  }
  0x12   : > { %s2158_s28 = scalar_lea.vmem %s2778_s0, %s1969_s22 }
  0x13   : > { %446 = vrot.lane.b32.xlu0 %v443_v10, %s2050_s18  ;;  %526 = vrot.lane.b32.xlu1 %v523_v11, %s2051_s19  ;;  %v2163_v20 = vld [vmem:[%s2158_s28 + $0x8] sm:$0xff]  ;;  %v2166_v21 = vld [vmem:[%s2158_s28 + $0x20] sm:$0xff]  ;;  %s2060_s18 = smov 96   ;;  %s2061_s19 = smov 95  }
  0x14   : > { %v2169_v22 = vld [vmem:[%s2158_s28 + $0x10] sm:$0xff]  ;;  %v2172_v23 = vld [vmem:[%s2158_s28 + $0x28] sm:$0xff]  ;;  %v2176_v24 = vpack.c.bf16 %v2166_v21, %v2163_v20  ;;  %v2183_v26 = vld [vmem:[%s2158_s28] sm:$0xff]  ;;  %v357_v41 = vmul.f32 %v2163_v20, %v353_v39  ;;  %v359_v42 = vmul.f32 %v2166_v21, %v353_v39 }
  0x15   : > { %v2180_v25 = vpack.c.bf16 %v2172_v23, %v2169_v22  ;;  %v2186_v27 = vld [vmem:[%s2158_s28 + $0x18] sm:$0xff]  ;;  %v2192_v29 = vld [vmem:[%s2158_s28 + $0x50] sm:$0xff]  ;;  %v2205_v32 = vld [vmem:[%s2158_s28 + $0x40] sm:$0xff]  ;;  %v356_v43 = vmul.f32 %v2183_v26, %v349_v40 }
  0x16   : > { %v2189_v28 = vld [vmem:[%s2158_s28 + $0x38] sm:$0xff]  ;;  %v2198_v30 = vpack.c.bf16 %v2186_v27, %v2183_v26  ;;  %v2211_v34 = vld [vmem:[%s2158_s28 + $0x30] sm:$0xff]  ;;  %v2214_v35 = vld [vmem:[%s2158_s28 + $0x48] sm:$0xff]  ;;  %v358_v44 = vmul.f32 %v2186_v27, %v349_v40  ;;  %v363_v46 = vmul.f32 %v2192_v29, %v353_v39  ;;  %v365_v49 = vpack.c.bf16 %v359_v42, %v357_v41 }
  0x17   : > { %653 = vrot.lane.b32.xlu0 %v648_v12, %s2052_s25  ;;  %655 = vrot.lane.b32.xlu1 %v652_v13, %s2052_s25  ;;  %v2202_v31 = vpack.c.bf16 %v2192_v29, %v2189_v28  ;;  %v2208_v33 = vld [vmem:[%s2158_s28 + $0x58] sm:$0xff]  ;;  %v2224_v37 = vpack.c.bf16 %v2214_v35, %v2211_v34  ;;  %v361_v45 = vmul.f32 %v2189_v28, %v353_v39 }
  0x18   : > { %v2220_v36 = vpack.c.bf16 %v2208_v33, %v2205_v32  ;;  %v360_v47 = vmul.f32 %v2211_v34, %v349_v40  ;;  %v362_v48 = vmul.f32 %v2214_v35, %v349_v40  ;;  %v364_v50 = vpack.c.bf16 %v358_v44, %v356_v43  ;;  %1228 = vmatprep.subr.bf16.mxu1 %v365_v49 }
  0x19   : > { %v367_v51 = vpack.c.bf16 %v363_v46, %v361_v45 }
  0x1a   : > { %1229 = vmatpush1.bf16.msra.mxu1 %v364_v50  ;;  %v366_v52 = vpack.c.bf16 %v362_v48, %v360_v47 }
  0x1b   : > { %735 = vrot.lane.b32.xlu1 %v732_v16, %s2053_s29  ;;  %733 = vrot.lane.b32.xlu0 %v728_v17, %s2053_s29 }
  0x1c   : > { %1230 = vmatprep.subr.bf16.mxu1 %v367_v51 }
  0x1e   : > { %1231 = vmatpush1.bf16.msra.mxu1 %v366_v52 }
  0x1f   : > { %864 = vrot.lane.b32.xlu1 %v861_v18, %s2054_s30  ;;  %862 = vrot.lane.b32.xlu0 %v857_v19, %s2054_s30 }
  0x23   : > { %398 = vrot.lane.b32.xlu0 %v2176_v24, %s2055_s10  ;;  %400 = vrot.lane.b32.xlu1 %v2180_v25, %s2055_s10 }
  0x27   : > { %396 = vrot.lane.b32.xlu0 %v2198_v30, %s2055_s10  ;;  %404 = vrot.lane.b32.xlu1 %v2202_v31, %s2055_s10 }
  0x2b   : > { %406 = vrot.lane.b32.xlu0 %v2220_v36, %s2055_s10  ;;  %402 = vrot.lane.b32.xlu1 %v2224_v37, %s2055_s10 }
  0x2f   : > { %608 = vrot.lane.b32.xlu0 %v2176_v24, %s2056_s13  ;;  %610 = vrot.lane.b32.xlu1 %v2180_v25, %s2056_s13 }
  0x33   : > { %606 = vrot.lane.b32.xlu0 %v2198_v30, %s2056_s13  ;;  %614 = vrot.lane.b32.xlu1 %v2202_v31, %s2056_s13 }
  0x37   : > { %612 = vrot.lane.b32.xlu1 %v2224_v37, %s2056_s13  ;;  %616 = vrot.lane.b32.xlu0 %v2220_v36, %s2056_s13 }
  0x81   : > { %v445_v53 = vpop.permute.xlu0 %444  ;;  %v2253_v54 = vpop.permute.xlu1 %524 }
  0x82   : > { %v453_v55 = vmul.f32 %v445_v53, %v2183_v26  ;;  %v456_v56 = vmul.f32 %v445_v53, %v2186_v27  ;;  %v533_v60 = vmul.f32 %v2253_v54, %v2183_v26  ;;  %v536_v61 = vmul.f32 %v2253_v54, %v2186_v27 }
  0x83   : > { %v459_v4 = vmul.f32 %v445_v53, %v2211_v34  ;;  %v462_v6 = vmul.f32 %v445_v53, %v2214_v35  ;;  %v539_v39 = vmul.f32 %v2253_v54, %v2211_v34  ;;  %v542_v40 = vmul.f32 %v2253_v54, %v2214_v35 }
  0x84   : > { %v465_v57 = vpack.c.bf16 %v456_v56, %v453_v55  ;;  %v545_v11 = vpack.c.bf16 %v536_v61, %v533_v60 }
  0x85   : > { %v447_v58 = vpop.permute.xlu0 %446  ;;  %v527_v59 = vpop.permute.xlu1 %526  ;;  %v468_v14 = vpack.c.bf16 %v462_v6, %v459_v4  ;;  %v548_v47 = vpack.c.bf16 %v542_v40, %v539_v39 }
  0x86   : > { %477 = vrot.lane.b32.xlu0 %v465_v57, %s2057_s15  ;;  %v455_v62 = vmul.f32 %v447_v58, %v2169_v22  ;;  %v458_v63 = vmul.f32 %v447_v58, %v2172_v23  ;;  %v461_v0 = vmul.f32 %v447_v58, %v2205_v32  ;;  %v464_v1 = vmul.f32 %v447_v58, %v2208_v33 }
  0x87   : > { %v535_v8 = vmul.f32 %v527_v59, %v2169_v22  ;;  %v538_v9 = vmul.f32 %v527_v59, %v2172_v23  ;;  %v541_v12 = vmul.f32 %v527_v59, %v2205_v32  ;;  %v544_v13 = vmul.f32 %v527_v59, %v2208_v33 }
  0x88   : > { %v467_v2 = vpack.c.bf16 %v458_v63, %v455_v62  ;;  %v470_v3 = vpack.c.bf16 %v464_v1, %v461_v0  ;;  %v449_v41 = vsel %vm448_vm0, %v445_v53, %v447_v58  ;;  %v529_v60 = vsel %vm528_vm1, %v2253_v54, %v527_v59 }
  0x89   : > { %v2268_v7 = vpop.permute.xlu0 %653  ;;  %v2272_v10 = vpop.permute.xlu1 %655  ;;  %v547_v15 = vpack.c.bf16 %v538_v9, %v535_v8  ;;  %v550_v18 = vpack.c.bf16 %v544_v13, %v541_v12  ;;  %v454_v48 = vmul.f32 %v449_v41, %v2163_v20  ;;  %v457_v49 = vmul.f32 %v449_v41, %v2166_v21 }
  0x8a   : > { %481 = vrot.lane.b32.xlu1 %v467_v2, %s2057_s15  ;;  %487 = vrot.lane.b32.xlu0 %v470_v3, %s2057_s15  ;;  %v662_v19 = vmul.f32 %v2268_v7, %v2183_v26  ;;  %v665_v38 = vmul.f32 %v2268_v7, %v2186_v27  ;;  %v664_v45 = vmul.f32 %v2272_v10, %v2169_v22 }
  0x8b   : > { %v667_v46 = vmul.f32 %v2272_v10, %v2172_v23  ;;  %v668_v53 = vmul.f32 %v2268_v7, %v2211_v34  ;;  %v671_v55 = vmul.f32 %v2268_v7, %v2214_v35  ;;  %v466_v56 = vpack.c.bf16 %v457_v49, %v454_v48 }
  0x8c   : > { %v674_v44 = vpack.c.bf16 %v665_v38, %v662_v19  ;;  %v670_v57 = vmul.f32 %v2272_v10, %v2205_v32  ;;  %v673_v58 = vmul.f32 %v2272_v10, %v2208_v33  ;;  %v460_v0 = vmul.f32 %v449_v41, %v2189_v28 }
  0x8d   : > { %v2278_v16 = vpop.permute.xlu1 %735  ;;  %v2280_v17 = vpop.permute.xlu0 %733  ;;  %v676_v52 = vpack.c.bf16 %v667_v46, %v664_v45  ;;  %v677_v63 = vpack.c.bf16 %v671_v55, %v668_v53  ;;  %v463_v4 = vmul.f32 %v449_v41, %v2192_v29  ;;  %v534_v6 = vmul.f32 %v529_v60, %v2163_v20 }
  0x8e   : > { %483 = vrot.lane.b32.xlu1 %v468_v14, %s2057_s15  ;;  %557 = vrot.lane.b32.xlu0 %v545_v11, %s2058_s16  ;;  %v679_v3 = vpack.c.bf16 %v673_v58, %v670_v57  ;;  %v537_v54 = vmul.f32 %v529_v60, %v2166_v21  ;;  %v744_v59 = vmul.f32 %v2278_v16, %v2169_v22 }
  0x8f   : > { %v747_v8 = vmul.f32 %v2278_v16, %v2172_v23  ;;  %v742_v9 = vmul.f32 %v2280_v17, %v2183_v26  ;;  %v745_v13 = vmul.f32 %v2280_v17, %v2186_v27  ;;  %v540_v40 = vmul.f32 %v529_v60, %v2189_v28 }
  0x90   : > { %v546_v19 = vpack.c.bf16 %v537_v54, %v534_v6  ;;  %v543_v41 = vmul.f32 %v529_v60, %v2192_v29  ;;  %v753_v45 = vmul.f32 %v2278_v16, %v2208_v33  ;;  %v748_v48 = vmul.f32 %v2280_v17, %v2211_v34 }
  0x91   : > { %v2292_v42 = vpop.permute.xlu1 %864  ;;  %v2294_v43 = vpop.permute.xlu0 %862  ;;  %v756_v38 = vpack.c.bf16 %v747_v8, %v744_v59  ;;  %v754_v39 = vpack.c.bf16 %v745_v13, %v742_v9  ;;  %v751_v49 = vmul.f32 %v2280_v17, %v2214_v35  ;;  %v989_v9 = vld [vmem:[%s2780_s2 + $0x8] sm:$0xff] }
  0x92   : > { %561 = vrot.lane.b32.xlu1 %v547_v15, %s2058_s16  ;;  %567 = vrot.lane.b32.xlu0 %v550_v18, %s2058_s16  ;;  %v469_v18 = vpack.c.bf16 %v463_v4, %v460_v0  ;;  %v549_v46 = vpack.c.bf16 %v543_v41, %v540_v40  ;;  %v871_v57 = vmul.f32 %v2294_v43, %v2183_v26  ;;  %v993_v13 = vld [vmem:[%s2780_s2 + $0x28] sm:$0xff]  ;;  %v996_v40 = vld [vmem:[%s2780_s2 + $0x40] sm:$0xff] }
  0x93   : > { %v876_v26 = vmul.f32 %v2292_v42, %v2172_v23  ;;  %v997_v41 = vld [vmem:[%s2780_s2 + $0x48] sm:$0xff] }
  0x95   : > { %v399_v50 = vpop.permute.xlu0 %398  ;;  %v401_v51 = vpop.permute.xlu1 %400 }
  0x96   : > { %563 = vrot.lane.b32.xlu1 %v548_v47, %s2058_s16  ;;  %686 = vrot.lane.b32.xlu0 %v674_v44, %s2059_s17  ;;  %v410_v1 = vsel %vm408_vm2, %v399_v50, %v401_v51  ;;  %v750_v44 = vmul.f32 %v2278_v16, %v2205_v32  ;;  %v757_v51 = vpack.c.bf16 %v751_v49, %v748_v48  ;;  %v995_v49 = vld [vmem:[%s2780_s2 + $0x38] sm:$0xff] }
  0x97   : > { %1232 = vmatprep.subr.bf16.mxu1 %v410_v1  ;;  %v1996_v1 = vld [vmem:[%s2779_s1 + $0x4] ss:$12 sps:$4 sm:$0xff]  }
  0x98   : > { %v759_v47 = vpack.c.bf16 %v753_v45, %v750_v44  ;;  %1260 = vmatprep.mubr.bf16.mxu1 %v1996_v1 }
  0x99   : > { %v397_v61 = vpop.permute.xlu0 %396  ;;  %v405_v62 = vpop.permute.xlu1 %404 }
  0x9a   : > { %690 = vrot.lane.b32.xlu1 %v676_v52, %s2059_s17  ;;  %479 = vrot.lane.b32.xlu0 %v466_v56, %s2057_s15  ;;  %v409_v2 = vsel %vm408_vm2, %v397_v61, %v399_v50  ;;  %v658_v50 = vsel %vm657_vm3, %v2268_v7, %v2272_v10  ;;  %v738_v10 = vsel %vm737_vm4, %v2280_v17, %v2278_v16 }
  0x9b   : > { %1233 = vmatpush1.bf16.msra.mxu1 %v409_v2  ;;  %v663_v52 = vmul.f32 %v658_v50, %v2163_v20  ;;  %v666_v53 = vmul.f32 %v658_v50, %v2166_v21  ;;  %v669_v56 = vmul.f32 %v658_v50, %v2189_v28  ;;  %v672_v7 = vmul.f32 %v658_v50, %v2192_v29 }
  0x9c   : > { %v743_v60 = vmul.f32 %v738_v10, %v2163_v20  ;;  %v746_v61 = vmul.f32 %v738_v10, %v2166_v21  ;;  %v879_v2 = vmul.f32 %v2292_v42, %v2205_v32 }
  0x9d   : > { %v407_v11 = vpop.permute.xlu0 %406  ;;  %v403_v12 = vpop.permute.xlu1 %402  ;;  %v675_v55 = vpack.c.bf16 %v666_v53, %v663_v52  ;;  %v678_v58 = vpack.c.bf16 %v672_v7, %v669_v56  ;;  %v998_v52 = vld [vmem:[%s2780_s2 + $0x50] sm:$0xff]  ;;  %v1000_v56 = vld [vmem:[%s2780_s2 + $0x60] sm:$0xff]  ;;  %v1001_v7 = vld [vmem:[%s2780_s2 + $0x68] sm:$0xff] }
  0x9e   : > { %692 = vrot.lane.b32.xlu1 %v677_v63, %s2059_s17  ;;  %696 = vrot.lane.b32.xlu0 %v679_v3, %s2059_s17  ;;  %v412_v14 = vsel %vm408_vm2, %v405_v62, %v407_v11  ;;  %v411_v15 = vsel %vm408_vm2, %v403_v12, %v405_v62  ;;  %v755_v17 = vpack.c.bf16 %v746_v61, %v743_v60  ;;  %v2063_v3 = vmov 0   ;;  %v988_v11 = vld [vmem:[%s2780_s2] sm:$0xff] }
  0x9f   : > { %1234 = vmatprep.subr.bf16.mxu1 %v412_v14  ;;  %v749_v62 = vmul.f32 %v738_v10, %v2189_v28  ;;  %v752_v63 = vmul.f32 %v738_v10, %v2192_v29  ;;  %1373 = vmatprep.mubr.bf16.mxu0 %v2063_v3  ;;  %v992_v12 = vld [vmem:[%s2780_s2 + $0x20] sm:$0xff] }
  0xa0   : > { %1235 = vmatpush1.bf16.msra.mxu1 %v411_v15  ;;  %1993 = vset.pattern.permute.xlu1 %v2063_v3 }
  0xa1   : > { %1992 = vset.pattern.permute.xlu0 %v2063_v3  ;;  %v2417_v6 = vpop.permute.xlu1 %610 }
  0xa2   : > { %485 = vrot.lane.b32.xlu1 %v469_v18, %s2057_s15  ;;  %559 = vrot.lane.b32.xlu0 %v546_v19, %s2058_s16  ;;  %v990_v18 = vld [vmem:[%s2780_s2 + $0x10] sm:$0xff] }
  0xa3   : > { %v994_v19 = vld [vmem:[%s2780_s2 + $0x30] sm:$0xff] }
  0xa5   : > { %v2421_v54 = vpop.permute.xlu1 %614 }
  0xa6   : > { %770 = vrot.lane.b32.xlu1 %v756_v38, %s2060_s18  ;;  %766 = vrot.lane.b32.xlu0 %v754_v39, %s2060_s18 }
  0xaa   : > { %565 = vrot.lane.b32.xlu1 %v549_v46, %s2058_s16  ;;  %776 = vrot.lane.b32.xlu0 %v759_v47, %s2060_s18  ;;  %v991_v46 = vld [vmem:[%s2780_s2 + $0x18] sm:$0xff] }
  0xae   : > { %772 = vrot.lane.b32.xlu1 %v757_v51, %s2060_s18  ;;  %817 = vrot.lane.b32.xlu0 %v2176_v24, %s2061_s19  ;;  %v874_v24 = vmul.f32 %v2294_v43, %v2186_v27 }
  0xb0   : > { %v883_v16 = vpack.c.bf16 %v874_v24, %v871_v57  ;;  %v999_v24 = vld [vmem:[%s2780_s2 + $0x58] sm:$0xff] }
  0xb2   : > { %819 = vrot.lane.b32.xlu1 %v2180_v25, %s2061_s19  ;;  %688 = vrot.lane.b32.xlu0 %v675_v55, %s2059_s17  ;;  %v873_v25 = vmul.f32 %v2292_v42, %v2169_v22  ;;  %v758_v22 = vpack.c.bf16 %v752_v63, %v749_v62 }
  0xb4   : > { %v885_v27 = vpack.c.bf16 %v876_v26, %v873_v25 }
  0xb6   : > { %694 = vrot.lane.b32.xlu1 %v678_v58, %s2059_s17  ;;  %815 = vrot.lane.b32.xlu0 %v2198_v30, %s2061_s19  ;;  %v867_v30 = vsel %vm866_vm5, %v2294_v43, %v2292_v42 }
  0xb7   : > { %v872_v23 = vmul.f32 %v867_v30, %v2163_v20  ;;  %v875_v0 = vmul.f32 %v867_v30, %v2166_v21  ;;  %v878_v21 = vmul.f32 %v867_v30, %v2189_v28  ;;  %v881_v4 = vmul.f32 %v867_v30, %v2192_v29  ;;  %v2415_v29 = vpop.permute.xlu0 %608 }
  0xb9   : > { %v884_v20 = vpack.c.bf16 %v875_v0, %v872_v23  ;;  %v620_v23 = vsel %vm618_vm8, %v2415_v29, %v2417_v6 }
  0xba   : > { %895 = vrot.lane.b32.xlu1 %v883_v16, %s2062_s20  ;;  %768 = vrot.lane.b32.xlu0 %v755_v17, %s2060_s18  ;;  %v1002_v16 = vld [vmem:[%s2780_s2 + $0x70] sm:$0xff]  ;;  %v1003_v17 = vld [vmem:[%s2780_s2 + $0x78] sm:$0xff] }
  0xbe   : > { %825 = vrot.lane.b32.xlu1 %v2220_v36, %s2061_s19  ;;  %899 = vrot.lane.b32.xlu0 %v885_v27, %s2062_s20  ;;  %v882_v36 = vmul.f32 %v2292_v42, %v2208_v33  ;;  %v877_v33 = vmul.f32 %v2294_v43, %v2211_v34  ;;  %v880_v42 = vmul.f32 %v2294_v43, %v2214_v35  ;;  %v2425_v34 = vpop.permute.xlu1 %612 }
  0xc0   : > { %v888_v32 = vpack.c.bf16 %v882_v36, %v879_v2  ;;  %v886_v28 = vpack.c.bf16 %v880_v42, %v877_v33 }
  0xc2   : > { %774 = vrot.lane.b32.xlu1 %v758_v22, %s2060_s18  ;;  %823 = vrot.lane.b32.xlu0 %v2202_v31, %s2061_s19  ;;  %v887_v31 = vpack.c.bf16 %v881_v4, %v878_v21  ;;  %v621_v4 = vsel %vm618_vm8, %v2425_v34, %v2421_v54 }
  0xc6   : > { %897 = vrot.lane.b32.xlu1 %v884_v20, %s2062_s20  ;;  %821 = vrot.lane.b32.xlu0 %v2224_v37, %s2061_s19  ;;  %v2419_v37 = vpop.permute.xlu0 %606 }
  0xc7   : > { %v619_v2 = vsel %vm618_vm8, %v2419_v37, %v2415_v29 }
  0xca   : > { %903 = vrot.lane.b32.xlu1 %v887_v31, %s2062_s20  ;;  %905 = vrot.lane.b32.xlu0 %v888_v32, %s2062_s20  ;;  %v2423_v59 = vpop.permute.xlu0 %616 }
  0xcb   : > { %v622_v36 = vsel %vm618_vm8, %v2421_v54, %v2423_v59 }
  0xce   : > { %901 = vrot.lane.b32.xlu1 %v886_v28, %s2062_s20  ;;  %1006 = vperm.xlu0 %1992, %v988_v11  }
  0xd2   : > { %1011 = vperm.xlu1 %1993, %v989_v9   ;;  %1031 = vperm.xlu0 %1992, %v993_v13  }
  0xd6   : > { %1026 = vperm.xlu1 %1993, %v992_v12   ;;  %1036 = vperm.xlu0 %1992, %v994_v19  }
  0xda   : > { %1016 = vperm.xlu1 %1993, %v990_v18   ;;  %1051 = vperm.xlu0 %1992, %v997_v41  }
  0xde   : > { %1046 = vperm.xlu1 %1993, %v996_v40   ;;  %1041 = vperm.xlu0 %1992, %v995_v49   ;;  %v1997_v49 = vld [vmem:[%s2779_s1 + $0x8] ss:$12 sps:$4 sm:$0xff]  }
  0xe2   : > { %1021 = vperm.xlu1 %1993, %v991_v46   ;;  %1066 = vperm.xlu0 %1992, %v1000_v56   ;;  %v1998_v46 = vld [vmem:[%s2779_s1 + $0x1c] ss:$12 sps:$4 sm:$0xff]   ;;  %v2005_v56 = vld [vmem:[%s2779_s1 + $0x38] ss:$12 sps:$4 sm:$0xff]  }
  0xe6   : > { %1056 = vperm.xlu1 %1993, %v998_v52   ;;  %1061 = vperm.xlu0 %1992, %v999_v24   ;;  %v2001_v52 = vld [vmem:[%s2779_s1 + $0x20] ss:$12 sps:$4 sm:$0xff]  }
  0xe7   : > { %v2012_v24 = vld [vmem:[%s2779_s1 + $0x60] ss:$12 sps:$4 sm:$0xff]  }
  0xea   : > { %1071 = vperm.xlu1 %1993, %v1001_v7   ;;  %1081 = vperm.xlu0 %1992, %v1003_v17   ;;  %v2008_v7 = vld [vmem:[%s2779_s1 + $0x48] ss:$12 sps:$4 sm:$0xff]   ;;  %v2022_v17 = vld [vmem:[%s2779_s1 + $0xac] ss:$12 sps:$4 sm:$0xff]  }
  0xee   : > { %1076 = vperm.xlu1 %1993, %v1002_v16   ;;  %v2018_v16 = vld [vmem:[%s2779_s1 + $0x94] ss:$12 sps:$4 sm:$0xff]  }
  0xf8   : > { %v478_v35 = vpop.permute.xlu0 %477 }
  0xfc   : > { %v482_v43 = vpop.permute.xlu1 %481  ;;  %v488_v8 = vpop.permute.xlu0 %487 }
 0x100   : > { %v484_v14 = vpop.permute.xlu1 %483  ;;  %v558_v15 = vpop.permute.xlu0 %557 }
 0x104   : > { %v562_v38 = vpop.permute.xlu1 %561  ;;  %v568_v39 = vpop.permute.xlu0 %567 }
 0x108   : > { %v564_v44 = vpop.permute.xlu1 %563  ;;  %v2451_v45 = vpop.permute.xlu0 %686 }
 0x10c   : > { %v691_v47 = vpop.permute.xlu1 %690  ;;  %v480_v48 = vpop.permute.xlu0 %479 }
 0x10d   : > { %v491_v50 = vsel %vm489_vm6, %v480_v48, %v482_v43  ;;  %v490_v51 = vsel %vm489_vm6, %v478_v35, %v480_v48 }
 0x10e   : > { %1236 = vmatprep.subr.bf16.mxu1 %v491_v50  ;;  %v2000_v50 = vld [vmem:[%s2779_s1 + $0x18] ss:$12 sps:$4 sm:$0xff]  }
 0x10f   : > { %1237 = vmatpush1.bf16.msra.mxu1 %v490_v51  ;;  %v2002_v51 = vld [vmem:[%s2779_s1 + $0x34] ss:$12 sps:$4 sm:$0xff]  }
 0x110   : > { %v693_v53 = vpop.permute.xlu1 %692  ;;  %v697_v55 = vpop.permute.xlu0 %696 }
 0x114   : > { %v486_v10 = vpop.permute.xlu1 %485  ;;  %v560_v57 = vpop.permute.xlu0 %559 }
 0x115   : > { %v493_v58 = vsel %vm489_vm6, %v486_v10, %v488_v8  ;;  %v492_v60 = vsel %vm489_vm6, %v484_v14, %v486_v10  ;;  %v571_v61 = vsel %vm569_vm7, %v560_v57, %v562_v38  ;;  %v570_v27 = vsel %vm569_vm7, %v558_v15, %v560_v57  ;;  %v2010_v10 = vld [vmem:[%s2779_s1 + $0x64] ss:$12 sps:$4 sm:$0xff]  }
 0x116   : > { %1238 = vmatprep.subr.bf16.mxu1 %v493_v58  ;;  %v2009_v57 = vld [vmem:[%s2779_s1 + $0x50] ss:$12 sps:$4 sm:$0xff]  }
 0x117   : > { %1239 = vmatpush1.bf16.msra.mxu1 %v492_v60  ;;  %v2014_v58 = vld [vmem:[%s2779_s1 + $0x7c] ss:$12 sps:$4 sm:$0xff]  }
 0x118   : > { %v771_v25 = vpop.permute.xlu1 %770  ;;  %v767_v26 = vpop.permute.xlu0 %766  ;;  %1240 = vmatprep.subr.bf16.mxu1 %v571_v61  ;;  %v2013_v60 = vld [vmem:[%s2779_s1 + $0x68] ss:$12 sps:$4 sm:$0xff]   ;;  %v2016_v61 = vld [vmem:[%s2779_s1 + $0x78] ss:$12 sps:$4 sm:$0xff]  }
 0x11b   : > { %1241 = vmatpush1.bf16.msra.mxu1 %v570_v27  ;;  %v2021_v27 = vld [vmem:[%s2779_s1 + $0x98] ss:$12 sps:$4 sm:$0xff]  }
 0x11c   : > { %v566_v62 = vpop.permute.xlu1 %565  ;;  %v777_v63 = vpop.permute.xlu0 %776 }
 0x11d   : > { %v573_v30 = vsel %vm569_vm7, %v566_v62, %v568_v39  ;;  %v572_v22 = vsel %vm569_vm7, %v564_v44, %v566_v62  ;;  %v2024_v62 = vld [vmem:[%s2779_s1 + $0xa8] ss:$12 sps:$4 sm:$0xff]  }
 0x11e   : > { %1242 = vmatprep.subr.bf16.mxu1 %v573_v30 }
 0x11f   : > { %1243 = vmatpush1.bf16.msra.mxu1 %v572_v22 }
 0x120   : > { %v773_v0 = vpop.permute.xlu1 %772  ;;  %v818_v1 = vpop.permute.xlu0 %817  ;;  %1244 = vmatprep.subr.bf16.mxu1 %v620_v23 }
 0x123   : > { %1245 = vmatpush1.bf16.msra.mxu1 %v619_v2 }
 0x124   : > { %v820_v20 = vpop.permute.xlu1 %819  ;;  %v689_v21 = vpop.permute.xlu0 %688  ;;  %1246 = vmatprep.subr.bf16.mxu1 %v622_v36 }
 0x125   : > { %v700_v31 = vsel %vm698_vm9, %v689_v21, %v691_v47  ;;  %v699_v42 = vsel %vm698_vm9, %v2451_v45, %v689_v21  ;;  %v829_v12 = vsel %vm827_vm11, %v818_v1, %v820_v20  ;;  %v1994_v45 = vld [vmem:[%s2779_s1] ss:$12 sps:$4 sm:$0xff]  }
 0x127   : > { %1247 = vmatpush1.bf16.msra.mxu1 %v621_v4 }
 0x128   : > { %v695_v32 = vpop.permute.xlu1 %694  ;;  %v816_v33 = vpop.permute.xlu0 %815  ;;  %1248 = vmatprep.subr.bf16.mxu1 %v700_v31 }
 0x129   : > { %v702_v28 = vsel %vm698_vm9, %v695_v32, %v697_v55  ;;  %v701_v37 = vsel %vm698_vm9, %v693_v53, %v695_v32  ;;  %v828_v19 = vsel %vm827_vm11, %v816_v33, %v818_v1  ;;  %v2004_v53 = vld [vmem:[%s2779_s1 + $0x30] ss:$12 sps:$4 sm:$0xff]   ;;  %v2006_v55 = vld [vmem:[%s2779_s1 + $0x4c] ss:$12 sps:$4 sm:$0xff]  }
 0x12b   : > { %1249 = vmatpush1.bf16.msra.mxu1 %v699_v42 }
 0x12c   : > { %v896_v29 = vpop.permute.xlu1 %895  ;;  %v769_v6 = vpop.permute.xlu0 %768  ;;  %1250 = vmatprep.subr.bf16.mxu1 %v702_v28 }
 0x12d   : > { %v780_v59 = vsel %vm778_vm10, %v769_v6, %v771_v25  ;;  %v779_v54 = vsel %vm778_vm10, %v767_v26, %v769_v6  ;;  %v2017_v25 = vld [vmem:[%s2779_s1 + $0x80] ss:$12 sps:$4 sm:$0xff]   ;;  %v2020_v26 = vld [vmem:[%s2779_s1 + $0x90] ss:$12 sps:$4 sm:$0xff]  }
 0x12f   : > { %1251 = vmatpush1.bf16.msra.mxu1 %v701_v37 }
 0x130   : > { %v826_v35 = vpop.permute.xlu1 %825  ;;  %v900_v43 = vpop.permute.xlu0 %899  ;;  %1252 = vmatprep.subr.bf16.mxu1 %v780_v59 }
 0x133   : > { %1253 = vmatpush1.bf16.msra.mxu1 %v779_v54 }
 0x134   : > { %v775_v34 = vpop.permute.xlu1 %774  ;;  %v824_v8 = vpop.permute.xlu0 %823 }
 0x135   : > { %v782_v9 = vsel %vm778_vm10, %v775_v34, %v777_v63  ;;  %v781_v11 = vsel %vm778_vm10, %v773_v0, %v775_v34  ;;  %v831_v38 = vsel %vm827_vm11, %v824_v8, %v826_v35  ;;  %v2025_v63 = vld [vmem:[%s2779_s1 + $0xb0] ss:$12 sps:$4 sm:$0xff]  }
 0x136   : > { %1254 = vmatprep.subr.bf16.mxu1 %v782_v9 }
 0x137   : > { %1255 = vmatpush1.bf16.msra.mxu1 %v781_v11 }
 0x138   : > { %v898_v13 = vpop.permute.xlu1 %897  ;;  %v822_v14 = vpop.permute.xlu0 %821  ;;  %1256 = vmatprep.subr.bf16.mxu1 %v829_v12 }
 0x139   : > { %v909_v15 = vsel %vm907_vm12, %v898_v13, %v900_v43  ;;  %v908_v18 = vsel %vm907_vm12, %v896_v29, %v898_v13  ;;  %v830_v44 = vsel %vm827_vm11, %v822_v14, %v824_v8 }
 0x13a   : > { %1341 = vmatprep.subr.bf16.mxu0 %v909_v15 }
 0x13b   : > { %1257 = vmatpush1.bf16.msra.mxu1 %v828_v19  ;;  %1342 = vmatpush1.bf16.msra.mxu0 %v908_v18 }
 0x13c   : > { %v904_v39 = vpop.permute.xlu1 %903  ;;  %v906_v40 = vpop.permute.xlu0 %905  ;;  %1258 = vmatprep.subr.bf16.mxu1 %v831_v38 }
 0x13d   : > { %v911_v41 = vsel %vm907_vm12, %v904_v39, %v906_v40 }
 0x13e   : > { %1343 = vmatprep.subr.bf16.mxu0 %v911_v41 }
 0x13f   : > { %1259 = vmatpush1.bf16.msra.mxu1 %v830_v44 }
 0x140   : > { %v902_v47 = vpop.permute.xlu1 %901 }
 0x141   : > { %v910_v48 = vsel %vm907_vm12, %v902_v47, %v904_v39 }
 0x142   : > { %1261 = vmatmul.mubr.bf16.vlgmr.msra.gmra.mrb[0].mxu1 %v1994_v45  ;;  %1344 = vmatpush1.bf16.msra.mxu0 %v910_v48 }
 0x143   : > { %1270 = vmatprep.mubr.bf16.mxu1 %v1998_v46 }
 0x145   : > { %1892 = vmatmul.mubr.msk.bf16.vlgmr.msra.gmra.mrb[0].mxu0 %vm737_vm4, %v1997_v49 }
 0x146   : > { %1383 = vmatprep.mubr.bf16.mxu0 %v2063_v3 }
 0x14a   : > { %1271 = vmatmul.mubr.bf16.gmra.mrb[4].mxu1 %v2000_v50 }
 0x14b   : > { %1280 = vmatprep.mubr.bf16.mxu1 %v2002_v51 }
 0x14d   : > { %1893 = vmatmul.mubr.msk.bf16.gmra.mrb[4].mxu0 %vm737_vm4, %v2001_v52  ;;  %v1007_v0 = vpop.permute.xlu0 %1006 }
 0x14e   : > { %1393 = vmatprep.mubr.bf16.mxu0 %v2063_v3 }
 0x151   : > { %v1012_v30 = vpop.permute.xlu1 %1011  ;;  %v1032_v43 = vpop.permute.xlu0 %1031 }
 0x152   : > { %1281 = vmatmul.mubr.bf16.gmra.mrb[8].mxu1 %v2004_v53 }
 0x153   : > { %1290 = vmatprep.mubr.bf16.mxu1 %v2006_v55 }
 0x155   : > { %1894 = vmatmul.mubr.msk.bf16.gmra.mrb[8].mxu0 %vm737_vm4, %v2005_v56  ;;  %v1027_v22 = vpop.permute.xlu1 %1026  ;;  %v1037_v41 = vpop.permute.xlu0 %1036 }
 0x156   : > { %1403 = vmatprep.mubr.bf16.mxu0 %v2063_v3 }
 0x159   : > { %v1017_v23 = vpop.permute.xlu1 %1016  ;;  %v1052_v56 = vpop.permute.xlu0 %1051 }
 0x15a   : > { %1291 = vmatmul.mubr.bf16.gmra.mrb[12].mxu1 %v2008_v7 }
 0x15b   : > { %1300 = vmatprep.mubr.bf16.mxu1 %v2010_v10 }
 0x15d   : > { %1895 = vmatmul.mubr.msk.bf16.gmra.mrb[12].mxu0 %vm737_vm4, %v2009_v57  ;;  %v2590_v4 = vpop.permute.xlu1 %1046 }
 0x15e   : > { %1413 = vmatprep.mubr.bf16.mxu0 %v2063_v3 }
 0x161   : > { %v1022_v34 = vpop.permute.xlu1 %1021 }
 0x162   : > { %1301 = vmatmul.mubr.bf16.gmra.mrb[16].mxu1 %v2012_v24 }
 0x163   : > { %1310 = vmatprep.mubr.bf16.mxu1 %v2014_v58 }
 0x165   : > { %1896 = vmatmul.mubr.msk.bf16.gmra.mrb[16].mxu0 %vm737_vm4, %v2013_v60 }
 0x166   : > { %1423 = vmatprep.mubr.bf16.mxu0 %v2063_v3 }
 0x16a   : > { %1311 = vmatmul.mubr.bf16.gmra.mrb[20].mxu1 %v2016_v61 }
 0x16b   : > { %1320 = vmatprep.mubr.bf16.mxu1 %v2018_v16 }
 0x16d   : > { %1897 = vmatmul.mubr.msk.bf16.gmra.mrb[20].mxu0 %vm737_vm4, %v2017_v25 }
 0x16e   : > { %1433 = vmatprep.mubr.bf16.mxu0 %v2063_v3 }
 0x172   : > { %1321 = vmatmul.mubr.bf16.gmra.mrb[24].mxu1 %v2020_v26 }
 0x173   : > { %1330 = vmatprep.mubr.bf16.mxu1 %v2022_v17 }
 0x175   : > { %1898 = vmatmul.mubr.msk.bf16.gmra.mrb[24].mxu0 %vm737_vm4, %v2021_v27 }
 0x176   : > { %1443 = vmatprep.mubr.bf16.mxu0 %v2063_v3 }
 0x17a   : > { %1331 = vmatmul.mubr.bf16.gmra.mrb[28].mxu1 %v2024_v62 }
 0x17d   : > { %1899 = vmatmul.mubr.msk.bf16.gmra.mrb[28].mxu0 %vm737_vm4, %v2025_v63 }
 0x215   : > { %v1262_v1 = vpop.f32.mrb[0].mxu1 }
 0x216   : > { %v1263_v2 = vadd.f32 %v1262_v1, %v1007_v0  ;;  %v1264_v36 = vpop.f32.mrb[1].mxu1 }
 0x217   : > { %v1265_v20 = vadd.f32 %v1264_v36, %v1007_v0  ;;  %v1266_v21 = vpop.f32.mrb[2].mxu1 }
 0x218   : > { %v1267_v31 = vadd.f32 %v1266_v21, %v1012_v30  ;;  %v1268_v3 = vpop.f32.mrb[3].mxu1  ;;  %v1375_v32 = vpop.f32.mrb[0].mxu0 }
 0x219   : > { %v1269_v33 = vadd.f32 %v1268_v3, %v1012_v30  ;;  %v2592_v42 = vadd.f32 %v1375_v32, %v1263_v2  ;;  %v1377_v28 = vpop.f32.mrb[1].mxu0 }
 0x21a   : > { %v2594_v29 = vadd.f32 %v1377_v28, %v1265_v20  ;;  %v1379_v6 = vpop.f32.mrb[2].mxu0 }
 0x21b   : > { %v2596_v37 = vadd.f32 %v1379_v6, %v1267_v31  ;;  %v1381_v59 = vpop.f32.mrb[3].mxu0 }
 0x21c   : > { %v2598_v35 = vadd.f32 %v1381_v59, %v1269_v33 }
 0x21d   : > { %v1272_v54 = vpop.f32.mrb[4].mxu1 }
 0x21e   : > { %v1273_v8 = vadd.f32 %v1272_v54, %v1017_v23  ;;  %v1274_v9 = vpop.f32.mrb[5].mxu1 }
 0x21f   : > { %v1275_v11 = vadd.f32 %v1274_v9, %v1017_v23  ;;  %v1276_v12 = vpop.f32.mrb[6].mxu1 }
 0x220   : > { %v1277_v13 = vadd.f32 %v1276_v12, %v1022_v34  ;;  %v1278_v14 = vpop.f32.mrb[7].mxu1  ;;  %v1385_v15 = vpop.f32.mrb[4].mxu0 }
 0x221   : > { %v1279_v18 = vadd.f32 %v1278_v14, %v1022_v34  ;;  %v2600_v19 = vadd.f32 %v1385_v15, %v1273_v8  ;;  %v1387_v38 = vpop.f32.mrb[5].mxu0 }
 0x222   : > { %v2602_v39 = vadd.f32 %v1387_v38, %v1275_v11  ;;  %v1389_v40 = vpop.f32.mrb[6].mxu0 }
 0x223   : > { %v2604_v44 = vadd.f32 %v1389_v40, %v1277_v13  ;;  %v1391_v45 = vpop.f32.mrb[7].mxu0 }
 0x224   : > { %v2606_v46 = vadd.f32 %v1391_v45, %v1279_v18 }
 0x225   : > { %v1282_v47 = vpop.f32.mrb[8].mxu1 }
 0x226   : > { %v1283_v48 = vadd.f32 %v1282_v47, %v1027_v22  ;;  %v1284_v49 = vpop.f32.mrb[9].mxu1 }
 0x227   : > { %v1285_v50 = vadd.f32 %v1284_v49, %v1027_v22  ;;  %v1286_v51 = vpop.f32.mrb[10].mxu1  ;;  %v1042_v22 = vpop.permute.xlu0 %1041 }
 0x228   : > { %v1287_v52 = vadd.f32 %v1286_v51, %v1032_v43  ;;  %v1288_v53 = vpop.f32.mrb[11].mxu1  ;;  %v1395_v55 = vpop.f32.mrb[8].mxu0 }
 0x229   : > { %v1289_v7 = vadd.f32 %v1288_v53, %v1032_v43  ;;  %v1396_v10 = vadd.f32 %v1395_v55, %v1283_v48  ;;  %v1397_v57 = vpop.f32.mrb[9].mxu0 }
 0x22a   : > { %v1398_v24 = vadd.f32 %v1397_v57, %v1285_v50  ;;  %v1399_v58 = vpop.f32.mrb[10].mxu0 }
 0x22b   : > { %v1454_v60 = vmax.f32 %v2592_v42, %v1396_v10  ;;  %v1400_v61 = vadd.f32 %v1399_v58, %v1287_v52  ;;  %v1401_v16 = vpop.f32.mrb[11].mxu0  ;;  %v1067_v13 = vpop.permute.xlu0 %1066 }
 0x22c   : > { %v1455_v25 = vmax.f32 %v2594_v29, %v1398_v24  ;;  %v1402_v26 = vadd.f32 %v1401_v16, %v1289_v7 }
 0x22d   : > { %v1456_v17 = vmax.f32 %v2596_v37, %v1400_v61  ;;  %v1292_v27 = vpop.f32.mrb[12].mxu1 }
 0x22e   : > { %v1457_v62 = vmax.f32 %v2598_v35, %v1402_v26  ;;  %v1293_v63 = vadd.f32 %v1292_v27, %v1037_v41  ;;  %v1294_v30 = vpop.f32.mrb[13].mxu1 }
 0x22f   : > { %v1295_v23 = vadd.f32 %v1294_v30, %v1037_v41  ;;  %v1296_v0 = vpop.f32.mrb[14].mxu1  ;;  %v1062_v51 = vpop.permute.xlu0 %1061 }
 0x230   : > { %v1297_v1 = vadd.f32 %v1296_v0, %v1042_v22  ;;  %v1298_v2 = vpop.f32.mrb[15].mxu1  ;;  %v1405_v36 = vpop.f32.mrb[12].mxu0 }
 0x231   : > { %v1299_v20 = vadd.f32 %v1298_v2, %v1042_v22  ;;  %v1406_v21 = vadd.f32 %v1405_v36, %v1293_v63  ;;  %v1407_v31 = vpop.f32.mrb[13].mxu0 }
 0x232   : > { %v1408_v3 = vadd.f32 %v1407_v31, %v1295_v23  ;;  %v1409_v32 = vpop.f32.mrb[14].mxu0 }
 0x233   : > { %v1458_v33 = vmax.f32 %v2600_v19, %v1406_v21  ;;  %v1410_v42 = vadd.f32 %v1409_v32, %v1297_v1  ;;  %v1411_v28 = vpop.f32.mrb[15].mxu0 }
 0x234   : > { %v1459_v29 = vmax.f32 %v2602_v39, %v1408_v3  ;;  %v1412_v6 = vadd.f32 %v1411_v28, %v1299_v20 }
 0x235   : > { %v1460_v37 = vmax.f32 %v2604_v44, %v1410_v42  ;;  %v1302_v59 = vpop.f32.mrb[16].mxu1 }
 0x236   : > { %v1461_v35 = vmax.f32 %v2606_v46, %v1412_v6  ;;  %v1303_v43 = vadd.f32 %v1302_v59, %v2590_v4  ;;  %v1304_v54 = vpop.f32.mrb[17].mxu1  ;;  %v1057_v46 = vpop.permute.xlu1 %1056 }
 0x237   : > { %v1305_v34 = vadd.f32 %v1304_v54, %v2590_v4  ;;  %v1306_v8 = vpop.f32.mrb[18].mxu1 }
 0x238   : > { %v1307_v9 = vadd.f32 %v1306_v8, %v1052_v56  ;;  %v1308_v11 = vpop.f32.mrb[19].mxu1  ;;  %v1415_v12 = vpop.f32.mrb[16].mxu0 }
 0x239   : > { %v1309_v14 = vadd.f32 %v1308_v11, %v1052_v56  ;;  %v1416_v15 = vadd.f32 %v1415_v12, %v1303_v43  ;;  %v1417_v18 = vpop.f32.mrb[17].mxu0  ;;  %v1082_v11 = vpop.permute.xlu0 %1081 }
 0x23a   : > { %v1418_v19 = vadd.f32 %v1417_v18, %v1305_v34  ;;  %v1419_v38 = vpop.f32.mrb[18].mxu0  ;;  %v1072_v23 = vpop.permute.xlu1 %1071 }
 0x23b   : > { %v1462_v39 = vmax.f32 %v1454_v60, %v1416_v15  ;;  %v1420_v40 = vadd.f32 %v1419_v38, %v1307_v9  ;;  %v1421_v41 = vpop.f32.mrb[19].mxu0 }
 0x23c   : > { %v1463_v44 = vmax.f32 %v1455_v25, %v1418_v19  ;;  %v1422_v45 = vadd.f32 %v1421_v41, %v1309_v14 }
 0x23d   : > { %v1464_v47 = vmax.f32 %v1456_v17, %v1420_v40  ;;  %v1312_v48 = vpop.f32.mrb[20].mxu1 }
 0x23e   : > { %v1465_v49 = vmax.f32 %v1457_v62, %v1422_v45  ;;  %v1313_v4 = vadd.f32 %v1312_v48, %v1057_v46  ;;  %v1314_v50 = vpop.f32.mrb[21].mxu1  ;;  %v1077_v59 = vpop.permute.xlu1 %1076 }
 0x23f   : > { %v1315_v52 = vadd.f32 %v1314_v50, %v1057_v46  ;;  %v1316_v53 = vpop.f32.mrb[22].mxu1 }
 0x240   : > { %v1317_v55 = vadd.f32 %v1316_v53, %v1062_v51  ;;  %v1318_v56 = vpop.f32.mrb[23].mxu1  ;;  %v1425_v7 = vpop.f32.mrb[20].mxu0  ;;  %v1544_v53 = vld [vmem:[%s2782_s4 + $0x8] sm:$0xff] }
 0x241   : > { %v1319_v10 = vadd.f32 %v1318_v56, %v1062_v51  ;;  %v1426_v57 = vadd.f32 %v1425_v7, %v1313_v4  ;;  %v1427_v24 = vpop.f32.mrb[21].mxu0  ;;  %v1545_v56 = vld [vmem:[%s2782_s4 + $0x10] sm:$0xff]  ;;  %v1575_v7 = vld [vmem:[%s2783_s5] sm:$0xff] }
 0x242   : > { %v1428_v58 = vadd.f32 %v1427_v24, %v1315_v52  ;;  %v1429_v60 = vpop.f32.mrb[22].mxu0  ;;  %v1577_v24 = vld [vmem:[%s2783_s5 + $0x10] sm:$0xff] }
 0x243   : > { %v1466_v61 = vmax.f32 %v1458_v33, %v1426_v57  ;;  %v1430_v16 = vadd.f32 %v1429_v60, %v1317_v55  ;;  %v1431_v25 = vpop.f32.mrb[23].mxu0  ;;  %v1543_v55 = vld [vmem:[%s2782_s4] sm:$0xff]  ;;  %v1546_v57 = vld [vmem:[%s2782_s4 + $0x18] sm:$0xff]  ;;  %v1608_v60 = vld [vmem:[%s2785_s7 + $0x8] sm:$0xff] }
 0x244   : > { %v1467_v26 = vmax.f32 %v1459_v29, %v1428_v58  ;;  %v1432_v17 = vadd.f32 %v1431_v25, %v1319_v10  ;;  %v1576_v10 = vld [vmem:[%s2783_s5 + $0x8] sm:$0xff]  ;;  %v1607_v58 = vld [vmem:[%s2785_s7] sm:$0xff] }
 0x245   : > { %v1468_v27 = vmax.f32 %v1460_v37, %v1430_v16  ;;  %v1322_v62 = vpop.f32.mrb[24].mxu1 }
 0x246   : > { %v1469_v63 = vmax.f32 %v1461_v35, %v1432_v17  ;;  %v1323_v30 = vadd.f32 %v1322_v62, %v1067_v13  ;;  %v1324_v22 = vpop.f32.mrb[25].mxu1 }
 0x247   : > { %v1325_v0 = vadd.f32 %v1324_v22, %v1067_v13  ;;  %v1326_v1 = vpop.f32.mrb[26].mxu1 }
 0x248   : > { %v1327_v2 = vadd.f32 %v1326_v1, %v1072_v23  ;;  %v1328_v36 = vpop.f32.mrb[27].mxu1  ;;  %v1435_v20 = vpop.f32.mrb[24].mxu0 }
 0x249   : > { %v1329_v21 = vadd.f32 %v1328_v36, %v1072_v23  ;;  %v1436_v31 = vadd.f32 %v1435_v20, %v1323_v30  ;;  %v1437_v3 = vpop.f32.mrb[25].mxu0 }
 0x24a   : > { %v1438_v32 = vadd.f32 %v1437_v3, %v1325_v0  ;;  %v1439_v33 = vpop.f32.mrb[26].mxu0 }
 0x24b   : > { %v1470_v42 = vmax.f32 %v1462_v39, %v1436_v31  ;;  %v1440_v28 = vadd.f32 %v1439_v33, %v1327_v2  ;;  %v1441_v29 = vpop.f32.mrb[27].mxu0 }
 0x24c   : > { %v1471_v6 = vmax.f32 %v1463_v44, %v1438_v32  ;;  %v1442_v37 = vadd.f32 %v1441_v29, %v1329_v21 }
 0x24d   : > { %v1472_v35 = vmax.f32 %v1464_v47, %v1440_v28  ;;  %v1332_v43 = vpop.f32.mrb[28].mxu1 }
 0x24e   : > { %v1473_v54 = vmax.f32 %v1465_v49, %v1442_v37  ;;  %v1333_v34 = vadd.f32 %v1332_v43, %v1077_v59  ;;  %v1334_v8 = vpop.f32.mrb[29].mxu1  ;;  %v1478_v9 = vadd.f32 %v1471_v6, %v1470_v42 }
 0x24f   : > { %v1335_v12 = vadd.f32 %v1334_v8, %v1077_v59  ;;  %v1336_v13 = vpop.f32.mrb[30].mxu1  ;;  %v1657_v8 = vld [vmem:[#allocation3] sm:$0x1] }
 0x250   : > { %v1337_v14 = vadd.f32 %v1336_v13, %v1082_v11  ;;  %v1338_v15 = vpop.f32.mrb[31].mxu1  ;;  %v1445_v18 = vpop.f32.mrb[28].mxu0  ;;  %1479 = vadd.xlane.f32.xlu1 %v1478_v9  ;;  %v1481_v19 = vadd.f32 %v1473_v54, %v1472_v35  ;;  %v1693_v9 = vld [vmem:[%s2784_s6] sm:$0xff]  ;;  %v1696_v13 = vld [vmem:[%s2784_s6 + $0x18] sm:$0xff] }
 0x251   : > { %v1339_v38 = vadd.f32 %v1338_v15, %v1082_v11  ;;  %v1446_v39 = vadd.f32 %v1445_v18, %v1333_v34  ;;  %v1447_v40 = vpop.f32.mrb[29].mxu0  ;;  %v1610_v34 = vld [vmem:[%s2785_s7 + $0x18] sm:$0xff]  ;;  %v1694_v11 = vld [vmem:[%s2784_s6 + $0x8] sm:$0xff]  ;;  %v1683_v18 = vld [vmem:[%s2158_s28 + $0x10] sm:$0xff] }
 0x252   : > { %v1448_v41 = vadd.f32 %v1447_v40, %v1335_v12  ;;  %v1449_v44 = vpop.f32.mrb[30].mxu0  ;;  %1482 = vadd.xlane.f32.xlu0 %v1481_v19  ;;  %v1695_v12 = vld [vmem:[%s2784_s6 + $0x10] sm:$0xff]  ;;  %v1682_v15 = vld [vmem:[%s2158_s28 + $0x8] sm:$0xff]  ;;  %v1684_v19 = vld [vmem:[%s2158_s28 + $0x18] sm:$0xff] }
 0x253   : > { %v1474_v45 = vmax.f32 %v1466_v61, %v1446_v39  ;;  %v1450_v46 = vadd.f32 %v1449_v44, %v1337_v14  ;;  %v1451_v47 = vpop.f32.mrb[31].mxu0  ;;  %v1578_v61 = vld [vmem:[%s2783_s5 + $0x18] sm:$0xff]  ;;  %v1681_v14 = vld [vmem:[%s2158_s28] sm:$0xff]  ;;  %v1686_v39 = vld [vmem:[%s2158_s28 + $0x28] sm:$0xff] }
 0x254   : > { %v1475_v48 = vmax.f32 %v1467_v26, %v1448_v41  ;;  %v1452_v49 = vadd.f32 %v1451_v47, %v1339_v38  ;;  %v1685_v38 = vld [vmem:[%s2158_s28 + $0x20] sm:$0xff]  ;;  %v1687_v40 = vld [vmem:[%s2158_s28 + $0x30] sm:$0xff]  ;;  %v1688_v41 = vld [vmem:[%s2158_s28 + $0x38] sm:$0xff] }
 0x255   : > { %v1476_v4 = vmax.f32 %v1468_v27, %v1450_v46  ;;  %v1689_v44 = vld [vmem:[%s2158_s28 + $0x40] sm:$0xff]  ;;  %v1691_v46 = vld [vmem:[%s2158_s28 + $0x50] sm:$0xff]  ;;  %v1692_v47 = vld [vmem:[%s2158_s28 + $0x58] sm:$0xff] }
 0x256   : > { %v1477_v50 = vmax.f32 %v1469_v63, %v1452_v49  ;;  %v1484_v51 = vadd.f32 %v1475_v48, %v1474_v45 }
 0x258   : > { %1485 = vadd.xlane.f32.xlu0 %v1484_v51  ;;  %v1487_v52 = vadd.f32 %v1477_v50, %v1476_v4 }
 0x25a   : > { %1488 = vadd.xlane.f32.xlu1 %v1487_v52 }
 0x26b   : > { %1554 = vperm.xlu1 %1993, %v1544_v53  }
 0x26e   : > { %1549 = vperm.xlu0 %1992, %v1543_v55  }
 0x26f   : > { %1559 = vperm.xlu1 %1993, %v1545_v56  }
 0x272   : > { %1581 = vperm.xlu0 %1992, %v1575_v7  }
 0x273   : > { %1586 = vperm.xlu1 %1993, %v1576_v10  }
 0x276   : > { %1564 = vperm.xlu0 %1992, %v1546_v57  }
 0x277   : > { %1591 = vperm.xlu1 %1993, %v1577_v24  }
 0x27a   : > { %1613 = vperm.xlu0 %1992, %v1607_v58  }
 0x27b   : > { %1618 = vperm.xlu1 %1993, %v1608_v60  }
 0x27e   : > { %1596 = vperm.xlu0 %1992, %v1578_v61  }
 0x2dd   : > { %v1480_v16 = vpop.xlane.xlu1 %1479 }
 0x2de   : > { %v1491_v25 = vmul.f32 0.00390625, %v1480_v16 }
 0x2df   : > { %v1483_v26 = vpop.xlane.xlu0 %1482 }
 0x2e0   : > { %v2648_v17 = vsub.f32 %v1470_v42, %v1491_v25  ;;  %v2650_v27 = vsub.f32 %v1471_v6, %v1491_v25  ;;  %v1492_v62 = vmul.f32 0.00390625, %v1483_v26 }
 0x2e2   : > { %v2652_v63 = vsub.f32 %v1472_v35, %v1492_v62  ;;  %v2654_v30 = vsub.f32 %v1473_v54, %v1492_v62  ;;  %v1503_v22 = vmul.f32 %v2648_v17, %v2648_v17  ;;  %v1504_v23 = vmul.f32 %v2650_v27, %v2650_v27  ;;  %v1609_v54 = vld [vmem:[%s2785_s7 + $0x10] sm:$0xff] }
 0x2e4   : > { %v1511_v0 = vadd.f32 %v1504_v23, %v1503_v22  ;;  %v1505_v1 = vmul.f32 %v2652_v63, %v2652_v63  ;;  %v1506_v2 = vmul.f32 %v2654_v30, %v2654_v30 }
 0x2e5   : > { %v1486_v36 = vpop.xlane.xlu0 %1485 }
 0x2e6   : > { %v1493_v20 = vmul.f32 0.00390625, %v1486_v36  ;;  %1512 = vadd.xlane.f32.xlu0 %v1511_v0  ;;  %v1514_v21 = vadd.f32 %v1506_v2, %v1505_v1 }
 0x2e7   : > { %v1489_v31 = vpop.xlane.xlu1 %1488 }
 0x2e8   : > { %v2664_v3 = vsub.f32 %v1474_v45, %v1493_v20  ;;  %v2666_v32 = vsub.f32 %v1475_v48, %v1493_v20  ;;  %v1494_v33 = vmul.f32 0.00390625, %v1489_v31  ;;  %1515 = vadd.xlane.f32.xlu1 %v1514_v21  ;;  %v1690_v45 = vld [vmem:[%s2158_s28 + $0x48] sm:$0xff]  ;;  %s1904_s28 = sshll.u32 %s2789_s12, 6 }
 0x2e9   : > { %s334_s25 = scalar_lea.vmem %s2787_s9, %s1904_s28 }
 0x2ea   : > { %v2668_v42 = vsub.f32 %v1476_v4, %v1494_v33  ;;  %v2670_v28 = vsub.f32 %v1477_v50, %v1494_v33  ;;  %v1507_v29 = vmul.f32 %v2664_v3, %v2664_v3  ;;  %v1508_v6 = vmul.f32 %v2666_v32, %v2666_v32 }
 0x2eb   : > { %v1555_v49 = vpop.permute.xlu1 %1554 }
 0x2ec   : > { %v1517_v37 = vadd.f32 %v1508_v6, %v1507_v29  ;;  %v1509_v59 = vmul.f32 %v2668_v42, %v2668_v42  ;;  %v1510_v35 = vmul.f32 %v2670_v28, %v2670_v28 }
 0x2ed   : > { %v1550_v48 = vpop.permute.xlu0 %1549 }
 0x2ee   : > { %1518 = vadd.xlane.f32.xlu0 %v1517_v37  ;;  %v1520_v43 = vadd.f32 %v1510_v35, %v1509_v59 }
 0x2ef   : > { %v1560_v50 = vpop.permute.xlu1 %1559 }
 0x2f0   : > { %1521 = vadd.xlane.f32.xlu1 %v1520_v43 }
 0x2f1   : > { %v1582_v4 = vpop.permute.xlu0 %1581 }
 0x2f3   : > { %v1587_v52 = vpop.permute.xlu1 %1586 }
 0x2f5   : > { %v1565_v51 = vpop.permute.xlu0 %1564 }
 0x2f7   : > { %v1592_v55 = vpop.permute.xlu1 %1591 }
 0x2f9   : > { %v1614_v53 = vpop.permute.xlu0 %1613 }
 0x2fb   : > { %v1619_v7 = vpop.permute.xlu1 %1618 }
 0x2fd   : > { %v1597_v56 = vpop.permute.xlu0 %1596 }
 0x301   : > { %1623 = vperm.xlu1 %1993, %v1609_v54  }
 0x304   : > { %1628 = vperm.xlu0 %1992, %v1610_v34  }
 0x305   : > { %1660 = vperm.xlu1 %1993, %v1657_v8  }
 0x308   : > { %1699 = vperm.xlu0 %1992, %v1693_v9  }
 0x309   : > { %1704 = vperm.xlu1 %1993, %v1694_v11  }
 0x30c   : > { %1709 = vperm.xlu0 %1992, %v1695_v12  }
 0x30d   : > { %1714 = vperm.xlu1 %1993, %v1696_v13  }
 0x310   : > { %1745 = vrot.lane.b32.xlu0 %v1681_v14, %s2056_s13 }
 0x311   : > { %1747 = vrot.lane.b32.xlu1 %v1682_v15, %s2056_s13 }
 0x314   : > { %1749 = vrot.lane.b32.xlu0 %v1683_v18, %s2056_s13 }
 0x315   : > { %1751 = vrot.lane.b32.xlu1 %v1684_v19, %s2056_s13 }
 0x318   : > { %1753 = vrot.lane.b32.xlu0 %v1685_v38, %s2056_s13 }
 0x319   : > { %1755 = vrot.lane.b32.xlu1 %v1686_v39, %s2056_s13 }
 0x31c   : > { %1757 = vrot.lane.b32.xlu0 %v1687_v40, %s2056_s13 }
 0x31d   : > { %1759 = vrot.lane.b32.xlu1 %v1688_v41, %s2056_s13 }
 0x320   : > { %1761 = vrot.lane.b32.xlu0 %v1689_v44, %s2056_s13 }
 0x321   : > { %1763 = vrot.lane.b32.xlu1 %v1690_v45, %s2056_s13 }
 0x324   : > { %1765 = vrot.lane.b32.xlu0 %v1691_v46, %s2056_s13 }
 0x325   : > { %1767 = vrot.lane.b32.xlu1 %v1692_v47, %s2056_s13 }
 0x373   : > { %v1513_v10 = vpop.xlane.xlu0 %1512 }
 0x374   : > { %v1523_v57 = vmul.f32 0.00390625, %v1513_v10 }
 0x375   : > { %v1516_v24 = vpop.xlane.xlu1 %1515 }
 0x376   : > { %v1527_v58 = vadd.f32 1e-05, %v1523_v57  ;;  %v1524_v60 = vmul.f32 0.00390625, %v1516_v24 }
 0x378   : > { %2026 = vrsqrt.f32 %v1527_v58  ;;  %v1528_v61 = vadd.f32 1e-05, %v1524_v60 }
 0x37a   : > { %2028 = vrsqrt.f32 %v1528_v61 }
 0x37b   : > { %v1519_v16 = vpop.xlane.xlu0 %1518 }
 0x37c   : > { %v1525_v25 = vmul.f32 0.00390625, %v1519_v16 }
 0x37d   : > { %v1522_v26 = vpop.xlane.xlu1 %1521 }
 0x37e   : > { %v1529_v62 = vadd.f32 1e-05, %v1525_v25  ;;  %v1526_v22 = vmul.f32 0.00390625, %v1522_v26 }
 0x380   : > { %2030 = vrsqrt.f32 %v1529_v62  ;;  %v1530_v23 = vadd.f32 1e-05, %v1526_v22 }
 0x381   : > { %v1624_v37 = vpop.permute.xlu1 %1623 }
 0x382   : > { %v2027_v0 = vpop.eup %2026  ;;  %2032 = vrsqrt.f32 %v1530_v23 }
 0x383   : > { %v1535_v1 = vmul.f32 %v2027_v0, %v2648_v17  ;;  %v1536_v2 = vmul.f32 %v2027_v0, %v2650_v27  ;;  %v1629_v12 = vpop.permute.xlu0 %1628 }
 0x384   : > { %v2029_v36 = vpop.eup %2028 }
 0x385   : > { %v1537_v20 = vmul.f32 %v2029_v36, %v2652_v63  ;;  %v1538_v21 = vmul.f32 %v2029_v36, %v2654_v30  ;;  %v1567_v31 = vmul.f32 %v1550_v48, %v1535_v1  ;;  %v1568_v33 = vmul.f32 %v1550_v48, %v1536_v2  ;;  %v1661_v15 = vpop.permute.xlu1 %1660 }
 0x386   : > { %v1666_v0 = vrot.slane %v1661_v15, %v2131_v5 }
 0x387   : > { %v1569_v29 = vmul.f32 %v1555_v49, %v1537_v20  ;;  %v1570_v6 = vmul.f32 %v1555_v49, %v1538_v21  ;;  %v2732_v27 = vadd.f32 %v1582_v4, %v1567_v31  ;;  %v2734_v34 = vadd.f32 %v1582_v4, %v1568_v33  ;;  %v1700_v4 = vpop.permute.xlu0 %1699 }
 0x389   : > { %v2726_v59 = vadd.f32 %v1587_v52, %v1569_v29  ;;  %v2728_v35 = vadd.f32 %v1587_v52, %v1570_v6  ;;  %v1631_v18 = vmul.f32 %v1614_v53, %v2732_v27  ;;  %v1632_v19 = vmul.f32 %v1614_v53, %v2734_v34 }
 0x38a   : > { %v2031_v43 = vpop.eup %2030 }
 0x38b   : > { %v1539_v54 = vmul.f32 %v2031_v43, %v2664_v3  ;;  %v1540_v17 = vmul.f32 %v2031_v43, %v2666_v32  ;;  %v1633_v9 = vmul.f32 %v1619_v7, %v2726_v59  ;;  %v1634_v11 = vmul.f32 %v1619_v7, %v2728_v35  ;;  %v1710_v57 = vpop.permute.xlu0 %1709 }
 0x38c   : > { %v2033_v63 = vpop.eup %2032 }
 0x38d   : > { %v1571_v30 = vmul.f32 %v1560_v50, %v1539_v54  ;;  %v1572_v8 = vmul.f32 %v1560_v50, %v1540_v17  ;;  %v1541_v13 = vmul.f32 %v2033_v63, %v2668_v42  ;;  %v1542_v14 = vmul.f32 %v2033_v63, %v2670_v28  ;;  %v1705_v50 = vpop.permute.xlu1 %1704 }
 0x38e   : > { %v1639_v40 = vadd.f32 %v1633_v9, %v1631_v18  ;;  %v1648_v41 = vadd.f32 %v1634_v11, %v1632_v19 }
 0x38f   : > { %v2740_v3 = vadd.f32 %v1592_v55, %v1571_v30  ;;  %v2742_v32 = vadd.f32 %v1592_v55, %v1572_v8  ;;  %v1573_v38 = vmul.f32 %v1565_v51, %v1541_v13  ;;  %v1574_v39 = vmul.f32 %v1565_v51, %v1542_v14  ;;  %v1746_v16 = vpop.permute.xlu0 %1745 }
 0x391   : > { %v1635_v44 = vmul.f32 %v1624_v37, %v2740_v3  ;;  %v1636_v45 = vmul.f32 %v1624_v37, %v2742_v32  ;;  %v2748_v42 = vadd.f32 %v1597_v56, %v1573_v38  ;;  %v2750_v28 = vadd.f32 %v1597_v56, %v1574_v39  ;;  %v1715_v24 = vpop.permute.xlu1 %1714 }
 0x393   : > { %v1640_v46 = vadd.f32 %v1639_v40, %v1635_v44  ;;  %v1649_v47 = vadd.f32 %v1648_v41, %v1636_v45  ;;  %v1637_v48 = vmul.f32 %v1629_v12, %v2748_v42  ;;  %v1638_v49 = vmul.f32 %v1629_v12, %v2750_v28  ;;  %v1750_v36 = vpop.permute.xlu0 %1749 }
 0x395   : > { %v1641_v52 = vadd.f32 %v1640_v46, %v1637_v48  ;;  %v1650_v51 = vadd.f32 %v1649_v47, %v1638_v49  ;;  %v1748_v25 = vpop.permute.xlu1 %1747 }
 0x396   : > { %v1770_v11 = vsel %vm618_vm8, %v1746_v16, %v1748_v25  ;;  %v1771_v12 = vsel %vm618_vm8, %v1748_v25, %v1750_v36 }
 0x397   : > { %v1642_v53 = vrot.slane %v1641_v52, 4  ;;  %v1651_v55 = vrot.slane %v1650_v51, 4  ;;  %v1754_v33 = vpop.permute.xlu0 %1753 }
 0x399   : > { %v1643_v7 = vadd.f32 %v1642_v53, %v1641_v52  ;;  %v1652_v10 = vadd.f32 %v1651_v55, %v1650_v51  ;;  %v1752_v20 = vpop.permute.xlu1 %1751 }
 0x39a   : > { %v1772_v13 = vsel %vm618_vm8, %v1752_v20, %v1754_v33 }
 0x39b   : > { %v1644_v58 = vrot.slane %v1643_v7, 2  ;;  %v1653_v60 = vrot.slane %v1652_v10, 2  ;;  %v1758_v6 = vpop.permute.xlu0 %1757 }
 0x39d   : > { %v1645_v56 = vadd.f32 %v1644_v58, %v1643_v7  ;;  %v1654_v61 = vadd.f32 %v1653_v60, %v1652_v10  ;;  %v1756_v29 = vpop.permute.xlu1 %1755 }
 0x39e   : > { %v1773_v14 = vsel %vm618_vm8, %v1754_v33, %v1756_v29 }
 0x39f   : > { %v1646_v26 = vrot.slane %v1645_v56, 1  ;;  %v1655_v62 = vrot.slane %v1654_v61, 1  ;;  %v1762_v30 = vpop.permute.xlu0 %1761 }
 0x3a1   : > { %v1647_v22 = vadd.f32 %v1646_v26, %v1645_v56  ;;  %v1656_v23 = vadd.f32 %v1655_v62, %v1654_v61  ;;  %v1760_v37 = vpop.permute.xlu1 %1759 }
 0x3a2   : > { %v1774_v18 = vsel %vm618_vm8, %v1758_v6, %v1760_v37  ;;  %v1775_v19 = vsel %vm618_vm8, %v1760_v37, %v1762_v30 }
 0x3a3   : > { %v1667_v1 = vadd.f32 %v1666_v0, %v1647_v22  ;;  %v1668_v2 = vadd.f32 %v1666_v0, %v1656_v23  ;;  %v1766_v8 = vpop.permute.xlu0 %1765 }
 0x3a5   : > { %v1900_v21 = vmul.f32 -1.442695, %v1667_v1  ;;  %v1901_v31 = vmul.f32 -1.442695, %v1668_v2  ;;  %v1764_v5 = vpop.permute.xlu1 %1763 }
 0x3a6   : > { %v1776_v38 = vsel %vm618_vm8, %v1764_v5, %v1766_v8 }
 0x3a7   : > { %2034 = vpow2.f32 %v1900_v21 }
 0x3a8   : > { %2036 = vpow2.f32 %v1901_v31 }
 0x3a9   : > { %v1768_v9 = vpop.permute.xlu1 %1767 }
 0x3aa   : > { %v1777_v39 = vsel %vm618_vm8, %v1766_v8, %v1768_v9 }
 0x3b1   : > { %v2035_v43 = vpop.eup %2034 }
 0x3b2   : > { %v2037_v54 = vpop.eup %2036  ;;  %v1675_v17 = vadd.f32 1.0, %v2035_v43 }
 0x3b3   : > { %v1676_v63 = vadd.f32 1.0, %v2037_v54 }
 0x3b4   : > { %2038 = vrcp.f32 %v1675_v17 }
 0x3b5   : > { %2040 = vrcp.f32 %v1676_v63 }
 0x3be   : > { %v2039_v15 = vpop.eup %2038 }
 0x3bf   : > { %v2041_v40 = vpop.eup %2040  ;;  %v1717_v41 = vadd.f32 %v2039_v15, %v1700_v4  ;;  %v1719_v44 = vadd.f32 %v2039_v15, %v1705_v50  ;;  %v1721_v45 = vadd.f32 %v2039_v15, %v1710_v57  ;;  %v1723_v46 = vadd.f32 %v2039_v15, %v1715_v24 }
 0x3c0   : > { %v1718_v47 = vadd.f32 %v2041_v40, %v1700_v4  ;;  %v1720_v48 = vadd.f32 %v2041_v40, %v1705_v50  ;;  %v1722_v49 = vadd.f32 %v2041_v40, %v1710_v57  ;;  %v1724_v52 = vadd.f32 %v2041_v40, %v1715_v24 }
 0x3c1   : > { %v1725_v51 = vmul.f32 %v1717_v41, %v2732_v27  ;;  %v1727_v53 = vmul.f32 %v1719_v44, %v2726_v59  ;;  %v1729_v55 = vmul.f32 %v1721_v45, %v2740_v3  ;;  %v1731_v7 = vmul.f32 %v1723_v46, %v2748_v42 }
 0x3c2   : > { %v1726_v10 = vmul.f32 %v1718_v47, %v2734_v34  ;;  %v1728_v58 = vmul.f32 %v1720_v48, %v2728_v35  ;;  %v1730_v60 = vmul.f32 %v1722_v49, %v2742_v32  ;;  %v1732_v56 = vmul.f32 %v1724_v52, %v2750_v28 }
 0x3c3   : > { %v1786_v4 = vadd.f32 %v1770_v11, %v1725_v51  ;;  %v1788_v27 = vadd.f32 %v1772_v13, %v1727_v53  ;;  %v1790_v50 = vadd.f32 %v1774_v18, %v1729_v55  ;;  %v1792_v59 = vadd.f32 %v1776_v38, %v1731_v7 }
 0x3c4   : > { %v1787_v57 = vadd.f32 %v1771_v12, %v1726_v10  ;;  %v1789_v3 = vadd.f32 %v1773_v14, %v1728_v58  ;;  %v1791_v24 = vadd.f32 %v1775_v19, %v1730_v60  ;;  %v1793_v42 = vadd.f32 %v1777_v39, %v1732_v56 }
 0x3c5   : > { %1794 = vst [vmem:[%s334_s25] sm:$0xff] %v1786_v4  ;;  %1796 = vst [vmem:[%s334_s25 + $0x10] sm:$0xff] %v1788_v27 }
 0x3c6   : > { %1798 = vst [vmem:[%s334_s25 + $0x20] sm:$0xff] %v1790_v50  ;;  %1800 = vst [vmem:[%s334_s25 + $0x30] sm:$0xff] %v1792_v59 }
 0x3c7   : > { %1795 = vst [vmem:[%s334_s25 + $0x8] sm:$0xff] %v1787_v57  ;;  %1797 = vst [vmem:[%s334_s25 + $0x18] sm:$0xff] %v1789_v3 }
 0x3c8   : > { %1799 = vst [vmem:[%s334_s25 + $0x28] sm:$0xff] %v1791_v24  ;;  %1801 = vst [vmem:[%s334_s25 + $0x38] sm:$0xff] %v1793_v42 }
 0x3c9 PF: > { %s21_s11 = sadd.s32 1, %s2048_s11  }
 0x3ca   : > { %p18_p4 = scmp.ge.s32.totalorder %s21_s11, 4  }
 0x3cc   :  { %20 = sbr.rel (!%p18_p4) target bundleno = 3 (0x3), region = 87 }

</bundles_post_ra>
